<compile_context>
chip_gen: v5e
topology: v5e:2x2
jax: 0.10.0
libtpu: 0.0.40
codegen_flags: <defaults>
</compile_context>

<pallas_src>
import jax
import jax.numpy as jnp
from jax import lax
from jax.experimental import pallas as pl
from jax.experimental.pallas import tpu as pltpu


def _make_lstm_classifier_kernel(T, Bp, H):
    """Returns the fused LSTM+classifier kernel closed over static sizes."""

    def kernel(x_ref, wx_ref, wh_ref, fcw_ref, fcb_ref, out_ref, xg_sc):
        # 1) Hoisted input projection (bias folded in via the ones column of x
        #    and the extra row of Wx) for ALL timesteps in one batched matmul:
        #    (T*Bp, I+1) @ (I+1, 4H) -> (T*Bp, 4H), bf16 operands, f32 acc.
        xg_sc[...] = jnp.dot(x_ref[...], wx_ref[...],
                             preferred_element_type=jnp.float32)

        # 2) Sequential recurrence entirely inside the kernel.  h/c live as
        #    loop-carry values (vregs), never round-tripping through VMEM.
        #    Only h @ Wh is on the serial critical path.
        def step(t, carry):
            h, c = carry
            start = pl.multiple_of(t * Bp, Bp)
            xg_t = xg_sc[pl.ds(start, Bp), :]                       # (Bp, 4H)
            gates = xg_t + jnp.dot(h.astype(wh_ref.dtype), wh_ref[...],
                                   preferred_element_type=jnp.float32)
            # sigmoid(x) = 0.5*tanh(0.5*x) + 0.5  (single EUP push per gate)
            f = 0.5 * jnp.tanh(0.5 * gates[:, 0 * H:1 * H]) + 0.5
            i = 0.5 * jnp.tanh(0.5 * gates[:, 1 * H:2 * H]) + 0.5
            o = 0.5 * jnp.tanh(0.5 * gates[:, 2 * H:3 * H]) + 0.5
            g = jnp.tanh(gates[:, 3 * H:4 * H])
            c_new = f * c + i * g
            h_new = o * jnp.tanh(c_new)
            return (h_new, c_new)

        h0 = jnp.zeros((Bp, H), jnp.float32)
        c0 = jnp.zeros((Bp, H), jnp.float32)
        h_fin, _ = lax.fori_loop(0, T, step, (h0, c0), unroll=True)

        # 3) Classifier on the final hidden state; lane-dense (Bp, Cp) store,
        #    fc bias pre-broadcast to (Bp, Cp).
        out_ref[...] = (jnp.dot(h_fin.astype(fcw_ref.dtype), fcw_ref[...],
                                preferred_element_type=jnp.float32)
                        + fcb_ref[...]).astype(out_ref.dtype)

    return kernel


def _padded_sizes(B, C):
    Bp = max(8, -(-B // 8) * 8)          # pad batch to a full sublane
    Cp = max(128, -(-C // 128) * 128)    # pad classes to a full lane width
    return Bp, Cp


def prepare_params(wx, wh, b, fcw, fcb, B):
    """One-time (outside the hot path) weight fusion / padding / bf16 cast.

    wx: (I, 4H); wh: (H, 4H); b: (1, 4H) fused gate bias (Wx-bias + Uh-bias);
    fcw: (H, C); fcb: (1, C).
    """
    I = wx.shape[0]
    H = wh.shape[0]
    C = fcw.shape[1]
    Bp, Cp = _padded_sizes(B, C)

    # Fold the fused gate bias into Wx as an extra input row (pairs with the
    # ones column appended to x in the forward wrapper).
    wx_aug = jnp.concatenate([wx, b.reshape(1, 4 * H)],
                             axis=0).astype(jnp.bfloat16)            # (I+1, 4H)
    wh_b = wh.astype(jnp.bfloat16)                                   # (H, 4H)
    fcw_p = (jnp.zeros((H, Cp), jnp.float32).at[:, :C].set(fcw)
             .astype(jnp.bfloat16))                                  # (H, Cp)
    fcb_p = (jnp.zeros((Bp, Cp), jnp.float32)
             .at[:, :C].set(jnp.broadcast_to(fcb, (Bp, C))))         # (Bp, Cp)
    return wx_aug, wh_b, fcw_p, fcb_p


@jax.jit
def lstm_classifier_forward(x, wx_aug, wh_b, fcw_p, fcb_p):
    """x: (T, B, I) f32; weights pre-prepared by prepare_params().
       Returns logits (B, C) f32."""
    T, B, I = x.shape
    Ia = wx_aug.shape[0]                 # I + 1 (bias row)
    H = wh_b.shape[0]
    Bp, Cp = fcb_p.shape
    C_real = Cp                          # real C recovered by caller slice

    # Per-call x prep only: pad batch to a full sublane, append the ones
    # column (bias), flatten time*batch, cast to bf16 for the MXU.
    xb = x.astype(jnp.bfloat16)
    x_pad = jnp.pad(xb, ((0, 0), (0, Bp - B), (0, 0)))               # (T, Bp, I)
    ones = jnp.ones((T, Bp, 1), jnp.bfloat16)
    x2 = jnp.concatenate([x_pad, ones], axis=-1).reshape(T * Bp, Ia)

    vmem = pl.BlockSpec(memory_space=pltpu.MemorySpace.VMEM)

    out = pl.pallas_call(
        _make_lstm_classifier_kernel(T, Bp, H),
        out_shape=jax.ShapeDtypeStruct((Bp, Cp), jnp.float32),
        in_specs=[vmem] * 5,             # everything resident, single-buffered
        out_specs=vmem,
        scratch_shapes=[
            pltpu.VMEM((T * Bp, 4 * H), jnp.float32),    # hoisted x@Wx (+bias)
        ],
    )(x2, wx_aug, wh_b, fcw_p, fcb_p)

    return out[:B, :]                    # caller slices [:, :C]


def _reference_forward_f32(x, wx, wh, b, fcw, fcb):
    """Full-f32 reference matching the PyTorch LSTM_Classifier numerics."""
    T, B, I = x.shape
    H = wh.shape[0]
    h = jnp.zeros((B, H), jnp.float32)
    c = jnp.zeros((B, H), jnp.float32)
    for t in range(T):
        gates = jnp.dot(x[t], wx) + jnp.dot(h, wh) + b
        f = jax.nn.sigmoid(gates[:, 0 * H:1 * H])
        i = jax.nn.sigmoid(gates[:, 1 * H:2 * H])
        o = jax.nn.sigmoid(gates[:, 2 * H:3 * H])
        g = jnp.tanh(gates[:, 3 * H:4 * H])
        c = f * c + i * g
        h = o * jnp.tanh(c)
    return jnp.dot(h, fcw) + fcb


def _reference_forward_bf16(x, wx, wh, b, fcw, fcb):
    """Reference mirroring the kernel's numerics (bf16 matmul operands,
       f32 accumulation and gate math, bf16-rounded bias)."""
    T, B, I = x.shape
    H = wh.shape[0]
    xb = x.astype(jnp.bfloat16)
    wxb = wx.astype(jnp.bfloat16)
    whb = wh.astype(jnp.bfloat16)
    fcwb = fcw.astype(jnp.bfloat16)
    b16 = b.astype(jnp.bfloat16).astype(jnp.float32)
    h = jnp.zeros((B, H), jnp.float32)
    c = jnp.zeros((B, H), jnp.float32)
    for t in range(T):
        gates = (jnp.dot(xb[t], wxb, preferred_element_type=jnp.float32)
                 + jnp.dot(h.astype(jnp.bfloat16), whb,
                           preferred_element_type=jnp.float32)
                 + b16)
        f = jax.nn.sigmoid(gates[:, 0 * H:1 * H])
        i = jax.nn.sigmoid(gates[:, 1 * H:2 * H])
        o = jax.nn.sigmoid(gates[:, 2 * H:3 * H])
        g = jnp.tanh(gates[:, 3 * H:4 * H])
        c = f * c + i * g
        h = o * jnp.tanh(c)
    return jnp.dot(h.astype(jnp.bfloat16), fcwb,
                   preferred_element_type=jnp.float32) + fcb


def _init_linear(key, in_features, out_features):
    """PyTorch nn.Linear default init: U(-1/sqrt(in), 1/sqrt(in)).
       Returns (W_T, b) with W_T shaped (in, out)."""
    kw, kb = jax.random.split(key)
    bound = 1.0 / jnp.sqrt(jnp.float32(in_features))
    w = jax.random.uniform(kw, (in_features, out_features), jnp.float32,
                           -bound, bound)
    b = jax.random.uniform(kb, (out_features,), jnp.float32, -bound, bound)
    return w, b


if __name__ == "__main__":
    # Shapes consistent with LSTM_Classifier defaults (scaled-down seq/batch):
    # seq_len=8, batch=2, input_size=28, hidden_size=128, classes=10.
    T, B, I, H, C = 8, 2, 28, 128, 10

    key = jax.random.PRNGKey(0)
    keys = jax.random.split(key, 10)

    # Per-gate Linears (W*: input->hidden, U*: hidden->hidden), gate order f,i,o,c.
    wf, bwf = _init_linear(keys[0], I, H)
    uf, buf = _init_linear(keys[1], H, H)
    wi, bwi = _init_linear(keys[2], I, H)
    ui, bui = _init_linear(keys[3], H, H)
    wo, bwo = _init_linear(keys[4], I, H)
    uo, buo = _init_linear(keys[5], H, H)
    wc, bwc = _init_linear(keys[6], I, H)
    uc, buc = _init_linear(keys[7], H, H)
    fcw, fcb = _init_linear(keys[8], H, C)

    # Fuse into single matmuls per step.
    wx = jnp.concatenate([wf, wi, wo, wc], axis=1)                  # (I, 4H)
    wh = jnp.concatenate([uf, ui, uo, uc], axis=1)                  # (H, 4H)
    bias = jnp.concatenate([bwf + buf, bwi + bui,
                            bwo + buo, bwc + buc])[None, :]         # (1, 4H)
    fcb2 = fcb[None, :]                                             # (1, C)

    x = jax.random.normal(keys[9], (T, B, I), jnp.float32)

    # One-time weight prep (pad / fuse bias / bf16 cast) outside the hot path.
    wx_aug, wh_b, fcw_p, fcb_p = prepare_params(wx, wh, bias, fcw, fcb2, B)

    out_full = lstm_classifier_forward(x, wx_aug, wh_b, fcw_p, fcb_p)
    out_full = jax.block_until_ready(out_full)
    out = out_full[:, :C]
    assert out.shape == (B, C)

    # Tight check: kernel logic vs. bf16-mirroring reference.
    ref_bf16 = _reference_forward_bf16(x, wx, wh, bias, fcw, fcb2)
    assert jnp.allclose(out, ref_bf16, atol=2e-3, rtol=2e-3), \
        "mismatch vs bf16-mirroring reference"

    # Fidelity check: bound the bf16 cast error against the full-f32
    # PyTorch-equivalent reference.
    ref_f32 = _reference_forward_f32(x, wx, wh, bias, fcw, fcb2)
    assert jnp.allclose(out, ref_f32, atol=5e-2, rtol=5e-2), \
        "mismatch vs full-f32 reference"

    print("KERNEL_OK")
</pallas_src>

<mosaic_0001>
module attributes {stable_mosaic.version = 11 : i64} {
  func.func @kernel(%arg0: memref<64x29xbf16, #tpu.memory_space<vmem>>, %arg1: memref<29x512xbf16, #tpu.memory_space<vmem>>, %arg2: memref<128x512xbf16, #tpu.memory_space<vmem>>, %arg3: memref<128x128xbf16, #tpu.memory_space<vmem>>, %arg4: memref<8x128xf32, #tpu.memory_space<vmem>>, %arg5: memref<8x128xf32, #tpu.memory_space<vmem>>, %arg6: memref<64x512xf32, #tpu.memory_space<vmem>>) attributes {dimension_semantics = [], scalar_prefetch = 0 : i64, scratch_operands = 1 : i64, tpu.core_type = #tpu.core_type<tc>} {
    %c0 = arith.constant 0 : index
    %c0_0 = arith.constant 0 : index
    %0 = vector.load %arg0[%c0, %c0_0] : memref<64x29xbf16, #tpu.memory_space<vmem>>, vector<64x29xbf16>
    %c0_1 = arith.constant 0 : index
    %c0_2 = arith.constant 0 : index
    %1 = vector.load %arg1[%c0_1, %c0_2] : memref<29x512xbf16, #tpu.memory_space<vmem>>, vector<29x512xbf16>
    %cst = arith.constant dense<0.000000e+00> : vector<64x512xf32>
    %2 = tpu.matmul %0, %1, %cst {dimension_numbers = #tpu.dot_dimension_numbers<[1], [0], [0], [1], [0, 0, 1, 1], [], []>} : vector<64x29xbf16>, vector<29x512xbf16>, vector<64x512xf32> -> vector<64x512xf32>
    %c0_3 = arith.constant 0 : index
    %c0_4 = arith.constant 0 : index
    %3 = vector.load %arg6[%c0_3, %c0_4] : memref<64x512xf32, #tpu.memory_space<vmem>>, vector<64x512xf32>
    tpu.vector_store %arg6[%c0_3, %c0_4], %2 {strides = array<i32>} : memref<64x512xf32, #tpu.memory_space<vmem>>, vector<64x512xf32>,
    %cst_5 = arith.constant 0.000000e+00 : f32
    %4 = vector.broadcast %cst_5 : f32 to vector<8x128xf32>
    %cst_6 = arith.constant 0.000000e+00 : f32
    %5 = vector.broadcast %cst_6 : f32 to vector<8x128xf32>
    %c0_i32 = arith.constant 0 : i32
    %c8_i32 = arith.constant 8 : i32
    %6 = arith.muli %c0_i32, %c8_i32 : i32
    %7 = tpu.assume_multiple %6, 8 : i32
    %8 = arith.index_cast %7 : i32 to index
    %c0_7 = arith.constant 0 : index
    %9 = vector.load %arg6[%8, %c0_7] : memref<64x512xf32, #tpu.memory_space<vmem>>, vector<8x512xf32>
    %10 = arith.truncf %4 : vector<8x128xf32> to vector<8x128xbf16>
    %c0_8 = arith.constant 0 : index
    %c0_9 = arith.constant 0 : index
    %11 = vector.load %arg2[%c0_8, %c0_9] : memref<128x512xbf16, #tpu.memory_space<vmem>>, vector<128x512xbf16>
    %cst_10 = arith.constant dense<0.000000e+00> : vector<8x512xf32>
    %12 = tpu.matmul %10, %11, %cst_10 {dimension_numbers = #tpu.dot_dimension_numbers<[1], [0], [0], [1], [0, 0, 1, 1], [], []>} : vector<8x128xbf16>, vector<128x512xbf16>, vector<8x512xf32> -> vector<8x512xf32>
    %13 = arith.addf %9, %12 : vector<8x512xf32>
    %14 = vector.extract_strided_slice %13 {offsets = [0, 0], sizes = [8, 128], strides = [1, 1]} : vector<8x512xf32> to vector<8x128xf32>
    %cst_11 = arith.constant 5.000000e-01 : f32
    %15 = vector.broadcast %cst_11 : f32 to vector<8x128xf32>
    %16 = arith.mulf %15, %14 : vector<8x128xf32>
    %17 = math.tanh %16 : vector<8x128xf32>
    %cst_12 = arith.constant 5.000000e-01 : f32
    %18 = vector.broadcast %cst_12 : f32 to vector<8x128xf32>
    %19 = arith.mulf %18, %17 : vector<8x128xf32>
    %cst_13 = arith.constant 5.000000e-01 : f32
    %20 = vector.broadcast %cst_13 : f32 to vector<8x128xf32>
    %21 = arith.addf %19, %20 : vector<8x128xf32>
    %22 = vector.extract_strided_slice %13 {offsets = [0, 128], sizes = [8, 128], strides = [1, 1]} : vector<8x512xf32> to vector<8x128xf32>
    %cst_14 = arith.constant 5.000000e-01 : f32
    %23 = vector.broadcast %cst_14 : f32 to vector<8x128xf32>
    %24 = arith.mulf %23, %22 : vector<8x128xf32>
    %25 = math.tanh %24 : vector<8x128xf32>
    %cst_15 = arith.constant 5.000000e-01 : f32
    %26 = vector.broadcast %cst_15 : f32 to vector<8x128xf32>
    %27 = arith.mulf %26, %25 : vector<8x128xf32>
    %cst_16 = arith.constant 5.000000e-01 : f32
    %28 = vector.broadcast %cst_16 : f32 to vector<8x128xf32>
    %29 = arith.addf %27, %28 : vector<8x128xf32>
    %30 = vector.extract_strided_slice %13 {offsets = [0, 256], sizes = [8, 128], strides = [1, 1]} : vector<8x512xf32> to vector<8x128xf32>
    %cst_17 = arith.constant 5.000000e-01 : f32
    %31 = vector.broadcast %cst_17 : f32 to vector<8x128xf32>
    %32 = arith.mulf %31, %30 : vector<8x128xf32>
    %33 = math.tanh %32 : vector<8x128xf32>
    %cst_18 = arith.constant 5.000000e-01 : f32
    %34 = vector.broadcast %cst_18 : f32 to vector<8x128xf32>
    %35 = arith.mulf %34, %33 : vector<8x128xf32>
    %cst_19 = arith.constant 5.000000e-01 : f32
    %36 = vector.broadcast %cst_19 : f32 to vector<8x128xf32>
    %37 = arith.addf %35, %36 : vector<8x128xf32>
    %38 = vector.extract_strided_slice %13 {offsets = [0, 384], sizes = [8, 128], strides = [1, 1]} : vector<8x512xf32> to vector<8x128xf32>
    %39 = math.tanh %38 : vector<8x128xf32>
    %40 = arith.mulf %21, %5 : vector<8x128xf32>
    %41 = arith.mulf %29, %39 : vector<8x128xf32>
    %42 = arith.addf %40, %41 : vector<8x128xf32>
    %43 = math.tanh %42 : vector<8x128xf32>
    %44 = arith.mulf %37, %43 : vector<8x128xf32>
    %c1_i32 = arith.constant 1 : i32
    %c8_i32_20 = arith.constant 8 : i32
    %45 = arith.muli %c1_i32, %c8_i32_20 : i32
    %46 = tpu.assume_multiple %45, 8 : i32
    %47 = arith.index_cast %46 : i32 to index
    %c0_21 = arith.constant 0 : index
    %48 = vector.load %arg6[%47, %c0_21] : memref<64x512xf32, #tpu.memory_space<vmem>>, vector<8x512xf32>
    %49 = arith.truncf %44 : vector<8x128xf32> to vector<8x128xbf16>
    %c0_22 = arith.constant 0 : index
    %c0_23 = arith.constant 0 : index
    %50 = vector.load %arg2[%c0_22, %c0_23] : memref<128x512xbf16, #tpu.memory_space<vmem>>, vector<128x512xbf16>
    %cst_24 = arith.constant dense<0.000000e+00> : vector<8x512xf32>
    %51 = tpu.matmul %49, %50, %cst_24 {dimension_numbers = #tpu.dot_dimension_numbers<[1], [0], [0], [1], [0, 0, 1, 1], [], []>} : vector<8x128xbf16>, vector<128x512xbf16>, vector<8x512xf32> -> vector<8x512xf32>
    %52 = arith.addf %48, %51 : vector<8x512xf32>
    %53 = vector.extract_strided_slice %52 {offsets = [0, 0], sizes = [8, 128], strides = [1, 1]} : vector<8x512xf32> to vector<8x128xf32>
    %cst_25 = arith.constant 5.000000e-01 : f32
    %54 = vector.broadcast %cst_25 : f32 to vector<8x128xf32>
    %55 = arith.mulf %54, %53 : vector<8x128xf32>
    %56 = math.tanh %55 : vector<8x128xf32>
    %cst_26 = arith.constant 5.000000e-01 : f32
    %57 = vector.broadcast %cst_26 : f32 to vector<8x128xf32>
    %58 = arith.mulf %57, %56 : vector<8x128xf32>
    %cst_27 = arith.constant 5.000000e-01 : f32
    %59 = vector.broadcast %cst_27 : f32 to vector<8x128xf32>
    %60 = arith.addf %58, %59 : vector<8x128xf32>
    %61 = vector.extract_strided_slice %52 {offsets = [0, 128], sizes = [8, 128], strides = [1, 1]} : vector<8x512xf32> to vector<8x128xf32>
    %cst_28 = arith.constant 5.000000e-01 : f32
    %62 = vector.broadcast %cst_28 : f32 to vector<8x128xf32>
    %63 = arith.mulf %62, %61 : vector<8x128xf32>
    %64 = math.tanh %63 : vector<8x128xf32>
    %cst_29 = arith.constant 5.000000e-01 : f32
    %65 = vector.broadcast %cst_29 : f32 to vector<8x128xf32>
    %66 = arith.mulf %65, %64 : vector<8x128xf32>
    %cst_30 = arith.constant 5.000000e-01 : f32
    %67 = vector.broadcast %cst_30 : f32 to vector<8x128xf32>
    %68 = arith.addf %66, %67 : vector<8x128xf32>
    %69 = vector.extract_strided_slice %52 {offsets = [0, 256], sizes = [8, 128], strides = [1, 1]} : vector<8x512xf32> to vector<8x128xf32>
    %cst_31 = arith.constant 5.000000e-01 : f32
    %70 = vector.broadcast %cst_31 : f32 to vector<8x128xf32>
    %71 = arith.mulf %70, %69 : vector<8x128xf32>
    %72 = math.tanh %71 : vector<8x128xf32>
    %cst_32 = arith.constant 5.000000e-01 : f32
    %73 = vector.broadcast %cst_32 : f32 to vector<8x128xf32>
    %74 = arith.mulf %73, %72 : vector<8x128xf32>
    %cst_33 = arith.constant 5.000000e-01 : f32
    %75 = vector.broadcast %cst_33 : f32 to vector<8x128xf32>
    %76 = arith.addf %74, %75 : vector<8x128xf32>
    %77 = vector.extract_strided_slice %52 {offsets = [0, 384], sizes = [8, 128], strides = [1, 1]} : vector<8x512xf32> to vector<8x128xf32>
    %78 = math.tanh %77 : vector<8x128xf32>
    %79 = arith.mulf %60, %42 : vector<8x128xf32>
    %80 = arith.mulf %68, %78 : vector<8x128xf32>
    %81 = arith.addf %79, %80 : vector<8x128xf32>
    %82 = math.tanh %81 : vector<8x128xf32>
    %83 = arith.mulf %76, %82 : vector<8x128xf32>
    %c2_i32 = arith.constant 2 : i32
    %c8_i32_34 = arith.constant 8 : i32
    %84 = arith.muli %c2_i32, %c8_i32_34 : i32
    %85 = tpu.assume_multiple %84, 8 : i32
    %86 = arith.index_cast %85 : i32 to index
    %c0_35 = arith.constant 0 : index
    %87 = vector.load %arg6[%86, %c0_35] : memref<64x512xf32, #tpu.memory_space<vmem>>, vector<8x512xf32>
    %88 = arith.truncf %83 : vector<8x128xf32> to vector<8x128xbf16>
    %c0_36 = arith.constant 0 : index
    %c0_37 = arith.constant 0 : index
    %89 = vector.load %arg2[%c0_36, %c0_37] : memref<128x512xbf16, #tpu.memory_space<vmem>>, vector<128x512xbf16>
    %cst_38 = arith.constant dense<0.000000e+00> : vector<8x512xf32>
    %90 = tpu.matmul %88, %89, %cst_38 {dimension_numbers = #tpu.dot_dimension_numbers<[1], [0], [0], [1], [0, 0, 1, 1], [], []>} : vector<8x128xbf16>, vector<128x512xbf16>, vector<8x512xf32> -> vector<8x512xf32>
    %91 = arith.addf %87, %90 : vector<8x512xf32>
    %92 = vector.extract_strided_slice %91 {offsets = [0, 0], sizes = [8, 128], strides = [1, 1]} : vector<8x512xf32> to vector<8x128xf32>
    %cst_39 = arith.constant 5.000000e-01 : f32
    %93 = vector.broadcast %cst_39 : f32 to vector<8x128xf32>
    %94 = arith.mulf %93, %92 : vector<8x128xf32>
    %95 = math.tanh %94 : vector<8x128xf32>
    %cst_40 = arith.constant 5.000000e-01 : f32
    %96 = vector.broadcast %cst_40 : f32 to vector<8x128xf32>
    %97 = arith.mulf %96, %95 : vector<8x128xf32>
    %cst_41 = arith.constant 5.000000e-01 : f32
    %98 = vector.broadcast %cst_41 : f32 to vector<8x128xf32>
    %99 = arith.addf %97, %98 : vector<8x128xf32>
    %100 = vector.extract_strided_slice %91 {offsets = [0, 128], sizes = [8, 128], strides = [1, 1]} : vector<8x512xf32> to vector<8x128xf32>
    %cst_42 = arith.constant 5.000000e-01 : f32
    %101 = vector.broadcast %cst_42 : f32 to vector<8x128xf32>
    %102 = arith.mulf %101, %100 : vector<8x128xf32>
    %103 = math.tanh %102 : vector<8x128xf32>
    %cst_43 = arith.constant 5.000000e-01 : f32
    %104 = vector.broadcast %cst_43 : f32 to vector<8x128xf32>
    %105 = arith.mulf %104, %103 : vector<8x128xf32>
    %cst_44 = arith.constant 5.000000e-01 : f32
    %106 = vector.broadcast %cst_44 : f32 to vector<8x128xf32>
    %107 = arith.addf %105, %106 : vector<8x128xf32>
    %108 = vector.extract_strided_slice %91 {offsets = [0, 256], sizes = [8, 128], strides = [1, 1]} : vector<8x512xf32> to vector<8x128xf32>
    %cst_45 = arith.constant 5.000000e-01 : f32
    %109 = vector.broadcast %cst_45 : f32 to vector<8x128xf32>
    %110 = arith.mulf %109, %108 : vector<8x128xf32>
    %111 = math.tanh %110 : vector<8x128xf32>
    %cst_46 = arith.constant 5.000000e-01 : f32
    %112 = vector.broadcast %cst_46 : f32 to vector<8x128xf32>
    %113 = arith.mulf %112, %111 : vector<8x128xf32>
    %cst_47 = arith.constant 5.000000e-01 : f32
    %114 = vector.broadcast %cst_47 : f32 to vector<8x128xf32>
    %115 = arith.addf %113, %114 : vector<8x128xf32>
    %116 = vector.extract_strided_slice %91 {offsets = [0, 384], sizes = [8, 128], strides = [1, 1]} : vector<8x512xf32> to vector<8x128xf32>
    %117 = math.tanh %116 : vector<8x128xf32>
    %118 = arith.mulf %99, %81 : vector<8x128xf32>
    %119 = arith.mulf %107, %117 : vector<8x128xf32>
    %120 = arith.addf %118, %119 : vector<8x128xf32>
    %121 = math.tanh %120 : vector<8x128xf32>
    %122 = arith.mulf %115, %121 : vector<8x128xf32>
    %c3_i32 = arith.constant 3 : i32
    %c8_i32_48 = arith.constant 8 : i32
    %123 = arith.muli %c3_i32, %c8_i32_48 : i32
    %124 = tpu.assume_multiple %123, 8 : i32
    %125 = arith.index_cast %124 : i32 to index
    %c0_49 = arith.constant 0 : index
    %126 = vector.load %arg6[%125, %c0_49] : memref<64x512xf32, #tpu.memory_space<vmem>>, vector<8x512xf32>
    %127 = arith.truncf %122 : vector<8x128xf32> to vector<8x128xbf16>
    %c0_50 = arith.constant 0 : index
    %c0_51 = arith.constant 0 : index
    %128 = vector.load %arg2[%c0_50, %c0_51] : memref<128x512xbf16, #tpu.memory_space<vmem>>, vector<128x512xbf16>
    %cst_52 = arith.constant dense<0.000000e+00> : vector<8x512xf32>
    %129 = tpu.matmul %127, %128, %cst_52 {dimension_numbers = #tpu.dot_dimension_numbers<[1], [0], [0], [1], [0, 0, 1, 1], [], []>} : vector<8x128xbf16>, vector<128x512xbf16>, vector<8x512xf32> -> vector<8x512xf32>
    %130 = arith.addf %126, %129 : vector<8x512xf32>
    %131 = vector.extract_strided_slice %130 {offsets = [0, 0], sizes = [8, 128], strides = [1, 1]} : vector<8x512xf32> to vector<8x128xf32>
    %cst_53 = arith.constant 5.000000e-01 : f32
    %132 = vector.broadcast %cst_53 : f32 to vector<8x128xf32>
    %133 = arith.mulf %132, %131 : vector<8x128xf32>
    %134 = math.tanh %133 : vector<8x128xf32>
    %cst_54 = arith.constant 5.000000e-01 : f32
    %135 = vector.broadcast %cst_54 : f32 to vector<8x128xf32>
    %136 = arith.mulf %135, %134 : vector<8x128xf32>
    %cst_55 = arith.constant 5.000000e-01 : f32
    %137 = vector.broadcast %cst_55 : f32 to vector<8x128xf32>
    %138 = arith.addf %136, %137 : vector<8x128xf32>
    %139 = vector.extract_strided_slice %130 {offsets = [0, 128], sizes = [8, 128], strides = [1, 1]} : vector<8x512xf32> to vector<8x128xf32>
    %cst_56 = arith.constant 5.000000e-01 : f32
    %140 = vector.broadcast %cst_56 : f32 to vector<8x128xf32>
    %141 = arith.mulf %140, %139 : vector<8x128xf32>
    %142 = math.tanh %141 : vector<8x128xf32>
    %cst_57 = arith.constant 5.000000e-01 : f32
    %143 = vector.broadcast %cst_57 : f32 to vector<8x128xf32>
    %144 = arith.mulf %143, %142 : vector<8x128xf32>
    %cst_58 = arith.constant 5.000000e-01 : f32
    %145 = vector.broadcast %cst_58 : f32 to vector<8x128xf32>
    %146 = arith.addf %144, %145 : vector<8x128xf32>
    %147 = vector.extract_strided_slice %130 {offsets = [0, 256], sizes = [8, 128], strides = [1, 1]} : vector<8x512xf32> to vector<8x128xf32>
    %cst_59 = arith.constant 5.000000e-01 : f32
    %148 = vector.broadcast %cst_59 : f32 to vector<8x128xf32>
    %149 = arith.mulf %148, %147 : vector<8x128xf32>
    %150 = math.tanh %149 : vector<8x128xf32>
    %cst_60 = arith.constant 5.000000e-01 : f32
    %151 = vector.broadcast %cst_60 : f32 to vector<8x128xf32>
    %152 = arith.mulf %151, %150 : vector<8x128xf32>
    %cst_61 = arith.constant 5.000000e-01 : f32
    %153 = vector.broadcast %cst_61 : f32 to vector<8x128xf32>
    %154 = arith.addf %152, %153 : vector<8x128xf32>
    %155 = vector.extract_strided_slice %130 {offsets = [0, 384], sizes = [8, 128], strides = [1, 1]} : vector<8x512xf32> to vector<8x128xf32>
    %156 = math.tanh %155 : vector<8x128xf32>
    %157 = arith.mulf %138, %120 : vector<8x128xf32>
    %158 = arith.mulf %146, %156 : vector<8x128xf32>
    %159 = arith.addf %157, %158 : vector<8x128xf32>
    %160 = math.tanh %159 : vector<8x128xf32>
    %161 = arith.mulf %154, %160 : vector<8x128xf32>
    %c4_i32 = arith.constant 4 : i32
    %c8_i32_62 = arith.constant 8 : i32
    %162 = arith.muli %c4_i32, %c8_i32_62 : i32
    %163 = tpu.assume_multiple %162, 8 : i32
    %164 = arith.index_cast %163 : i32 to index
    %c0_63 = arith.constant 0 : index
    %165 = vector.load %arg6[%164, %c0_63] : memref<64x512xf32, #tpu.memory_space<vmem>>, vector<8x512xf32>
    %166 = arith.truncf %161 : vector<8x128xf32> to vector<8x128xbf16>
    %c0_64 = arith.constant 0 : index
    %c0_65 = arith.constant 0 : index
    %167 = vector.load %arg2[%c0_64, %c0_65] : memref<128x512xbf16, #tpu.memory_space<vmem>>, vector<128x512xbf16>
    %cst_66 = arith.constant dense<0.000000e+00> : vector<8x512xf32>
    %168 = tpu.matmul %166, %167, %cst_66 {dimension_numbers = #tpu.dot_dimension_numbers<[1], [0], [0], [1], [0, 0, 1, 1], [], []>} : vector<8x128xbf16>, vector<128x512xbf16>, vector<8x512xf32> -> vector<8x512xf32>
    %169 = arith.addf %165, %168 : vector<8x512xf32>
    %170 = vector.extract_strided_slice %169 {offsets = [0, 0], sizes = [8, 128], strides = [1, 1]} : vector<8x512xf32> to vector<8x128xf32>
    %cst_67 = arith.constant 5.000000e-01 : f32
    %171 = vector.broadcast %cst_67 : f32 to vector<8x128xf32>
    %172 = arith.mulf %171, %170 : vector<8x128xf32>
    %173 = math.tanh %172 : vector<8x128xf32>
    %cst_68 = arith.constant 5.000000e-01 : f32
    %174 = vector.broadcast %cst_68 : f32 to vector<8x128xf32>
    %175 = arith.mulf %174, %173 : vector<8x128xf32>
    %cst_69 = arith.constant 5.000000e-01 : f32
    %176 = vector.broadcast %cst_69 : f32 to vector<8x128xf32>
    %177 = arith.addf %175, %176 : vector<8x128xf32>
    %178 = vector.extract_strided_slice %169 {offsets = [0, 128], sizes = [8, 128], strides = [1, 1]} : vector<8x512xf32> to vector<8x128xf32>
    %cst_70 = arith.constant 5.000000e-01 : f32
    %179 = vector.broadcast %cst_70 : f32 to vector<8x128xf32>
    %180 = arith.mulf %179, %178 : vector<8x128xf32>
    %181 = math.tanh %180 : vector<8x128xf32>
    %cst_71 = arith.constant 5.000000e-01 : f32
    %182 = vector.broadcast %cst_71 : f32 to vector<8x128xf32>
    %183 = arith.mulf %182, %181 : vector<8x128xf32>
    %cst_72 = arith.constant 5.000000e-01 : f32
    %184 = vector.broadcast %cst_72 : f32 to vector<8x128xf32>
    %185 = arith.addf %183, %184 : vector<8x128xf32>
    %186 = vector.extract_strided_slice %169 {offsets = [0, 256], sizes = [8, 128], strides = [1, 1]} : vector<8x512xf32> to vector<8x128xf32>
    %cst_73 = arith.constant 5.000000e-01 : f32
    %187 = vector.broadcast %cst_73 : f32 to vector<8x128xf32>
    %188 = arith.mulf %187, %186 : vector<8x128xf32>
    %189 = math.tanh %188 : vector<8x128xf32>
    %cst_74 = arith.constant 5.000000e-01 : f32
    %190 = vector.broadcast %cst_74 : f32 to vector<8x128xf32>
    %191 = arith.mulf %190, %189 : vector<8x128xf32>
    %cst_75 = arith.constant 5.000000e-01 : f32
    %192 = vector.broadcast %cst_75 : f32 to vector<8x128xf32>
    %193 = arith.addf %191, %192 : vector<8x128xf32>
    %194 = vector.extract_strided_slice %169 {offsets = [0, 384], sizes = [8, 128], strides = [1, 1]} : vector<8x512xf32> to vector<8x128xf32>
    %195 = math.tanh %194 : vector<8x128xf32>
    %196 = arith.mulf %177, %159 : vector<8x128xf32>
    %197 = arith.mulf %185, %195 : vector<8x128xf32>
    %198 = arith.addf %196, %197 : vector<8x128xf32>
    %199 = math.tanh %198 : vector<8x128xf32>
    %200 = arith.mulf %193, %199 : vector<8x128xf32>
    %c5_i32 = arith.constant 5 : i32
    %c8_i32_76 = arith.constant 8 : i32
    %201 = arith.muli %c5_i32, %c8_i32_76 : i32
    %202 = tpu.assume_multiple %201, 8 : i32
    %203 = arith.index_cast %202 : i32 to index
    %c0_77 = arith.constant 0 : index
    %204 = vector.load %arg6[%203, %c0_77] : memref<64x512xf32, #tpu.memory_space<vmem>>, vector<8x512xf32>
    %205 = arith.truncf %200 : vector<8x128xf32> to vector<8x128xbf16>
    %c0_78 = arith.constant 0 : index
    %c0_79 = arith.constant 0 : index
    %206 = vector.load %arg2[%c0_78, %c0_79] : memref<128x512xbf16, #tpu.memory_space<vmem>>, vector<128x512xbf16>
    %cst_80 = arith.constant dense<0.000000e+00> : vector<8x512xf32>
    %207 = tpu.matmul %205, %206, %cst_80 {dimension_numbers = #tpu.dot_dimension_numbers<[1], [0], [0], [1], [0, 0, 1, 1], [], []>} : vector<8x128xbf16>, vector<128x512xbf16>, vector<8x512xf32> -> vector<8x512xf32>
    %208 = arith.addf %204, %207 : vector<8x512xf32>
    %209 = vector.extract_strided_slice %208 {offsets = [0, 0], sizes = [8, 128], strides = [1, 1]} : vector<8x512xf32> to vector<8x128xf32>
    %cst_81 = arith.constant 5.000000e-01 : f32
    %210 = vector.broadcast %cst_81 : f32 to vector<8x128xf32>
    %211 = arith.mulf %210, %209 : vector<8x128xf32>
    %212 = math.tanh %211 : vector<8x128xf32>
    %cst_82 = arith.constant 5.000000e-01 : f32
    %213 = vector.broadcast %cst_82 : f32 to vector<8x128xf32>
    %214 = arith.mulf %213, %212 : vector<8x128xf32>
    %cst_83 = arith.constant 5.000000e-01 : f32
    %215 = vector.broadcast %cst_83 : f32 to vector<8x128xf32>
    %216 = arith.addf %214, %215 : vector<8x128xf32>
    %217 = vector.extract_strided_slice %208 {offsets = [0, 128], sizes = [8, 128], strides = [1, 1]} : vector<8x512xf32> to vector<8x128xf32>
    %cst_84 = arith.constant 5.000000e-01 : f32
    %218 = vector.broadcast %cst_84 : f32 to vector<8x128xf32>
    %219 = arith.mulf %218, %217 : vector<8x128xf32>
    %220 = math.tanh %219 : vector<8x128xf32>
    %cst_85 = arith.constant 5.000000e-01 : f32
    %221 = vector.broadcast %cst_85 : f32 to vector<8x128xf32>
    %222 = arith.mulf %221, %220 : vector<8x128xf32>
    %cst_86 = arith.constant 5.000000e-01 : f32
    %223 = vector.broadcast %cst_86 : f32 to vector<8x128xf32>
    %224 = arith.addf %222, %223 : vector<8x128xf32>
    %225 = vector.extract_strided_slice %208 {offsets = [0, 256], sizes = [8, 128], strides = [1, 1]} : vector<8x512xf32> to vector<8x128xf32>
    %cst_87 = arith.constant 5.000000e-01 : f32
    %226 = vector.broadcast %cst_87 : f32 to vector<8x128xf32>
    %227 = arith.mulf %226, %225 : vector<8x128xf32>
    %228 = math.tanh %227 : vector<8x128xf32>
    %cst_88 = arith.constant 5.000000e-01 : f32
    %229 = vector.broadcast %cst_88 : f32 to vector<8x128xf32>
    %230 = arith.mulf %229, %228 : vector<8x128xf32>
    %cst_89 = arith.constant 5.000000e-01 : f32
    %231 = vector.broadcast %cst_89 : f32 to vector<8x128xf32>
    %232 = arith.addf %230, %231 : vector<8x128xf32>
    %233 = vector.extract_strided_slice %208 {offsets = [0, 384], sizes = [8, 128], strides = [1, 1]} : vector<8x512xf32> to vector<8x128xf32>
    %234 = math.tanh %233 : vector<8x128xf32>
    %235 = arith.mulf %216, %198 : vector<8x128xf32>
    %236 = arith.mulf %224, %234 : vector<8x128xf32>
    %237 = arith.addf %235, %236 : vector<8x128xf32>
    %238 = math.tanh %237 : vector<8x128xf32>
    %239 = arith.mulf %232, %238 : vector<8x128xf32>
    %c6_i32 = arith.constant 6 : i32
    %c8_i32_90 = arith.constant 8 : i32
    %240 = arith.muli %c6_i32, %c8_i32_90 : i32
    %241 = tpu.assume_multiple %240, 8 : i32
    %242 = arith.index_cast %241 : i32 to index
    %c0_91 = arith.constant 0 : index
    %243 = vector.load %arg6[%242, %c0_91] : memref<64x512xf32, #tpu.memory_space<vmem>>, vector<8x512xf32>
    %244 = arith.truncf %239 : vector<8x128xf32> to vector<8x128xbf16>
    %c0_92 = arith.constant 0 : index
    %c0_93 = arith.constant 0 : index
    %245 = vector.load %arg2[%c0_92, %c0_93] : memref<128x512xbf16, #tpu.memory_space<vmem>>, vector<128x512xbf16>
    %cst_94 = arith.constant dense<0.000000e+00> : vector<8x512xf32>
    %246 = tpu.matmul %244, %245, %cst_94 {dimension_numbers = #tpu.dot_dimension_numbers<[1], [0], [0], [1], [0, 0, 1, 1], [], []>} : vector<8x128xbf16>, vector<128x512xbf16>, vector<8x512xf32> -> vector<8x512xf32>
    %247 = arith.addf %243, %246 : vector<8x512xf32>
    %248 = vector.extract_strided_slice %247 {offsets = [0, 0], sizes = [8, 128], strides = [1, 1]} : vector<8x512xf32> to vector<8x128xf32>
    %cst_95 = arith.constant 5.000000e-01 : f32
    %249 = vector.broadcast %cst_95 : f32 to vector<8x128xf32>
    %250 = arith.mulf %249, %248 : vector<8x128xf32>
    %251 = math.tanh %250 : vector<8x128xf32>
    %cst_96 = arith.constant 5.000000e-01 : f32
    %252 = vector.broadcast %cst_96 : f32 to vector<8x128xf32>
    %253 = arith.mulf %252, %251 : vector<8x128xf32>
    %cst_97 = arith.constant 5.000000e-01 : f32
    %254 = vector.broadcast %cst_97 : f32 to vector<8x128xf32>
    %255 = arith.addf %253, %254 : vector<8x128xf32>
    %256 = vector.extract_strided_slice %247 {offsets = [0, 128], sizes = [8, 128], strides = [1, 1]} : vector<8x512xf32> to vector<8x128xf32>
    %cst_98 = arith.constant 5.000000e-01 : f32
    %257 = vector.broadcast %cst_98 : f32 to vector<8x128xf32>
    %258 = arith.mulf %257, %256 : vector<8x128xf32>
    %259 = math.tanh %258 : vector<8x128xf32>
    %cst_99 = arith.constant 5.000000e-01 : f32
    %260 = vector.broadcast %cst_99 : f32 to vector<8x128xf32>
    %261 = arith.mulf %260, %259 : vector<8x128xf32>
    %cst_100 = arith.constant 5.000000e-01 : f32
    %262 = vector.broadcast %cst_100 : f32 to vector<8x128xf32>
    %263 = arith.addf %261, %262 : vector<8x128xf32>
    %264 = vector.extract_strided_slice %247 {offsets = [0, 256], sizes = [8, 128], strides = [1, 1]} : vector<8x512xf32> to vector<8x128xf32>
    %cst_101 = arith.constant 5.000000e-01 : f32
    %265 = vector.broadcast %cst_101 : f32 to vector<8x128xf32>
    %266 = arith.mulf %265, %264 : vector<8x128xf32>
    %267 = math.tanh %266 : vector<8x128xf32>
    %cst_102 = arith.constant 5.000000e-01 : f32
    %268 = vector.broadcast %cst_102 : f32 to vector<8x128xf32>
    %269 = arith.mulf %268, %267 : vector<8x128xf32>
    %cst_103 = arith.constant 5.000000e-01 : f32
    %270 = vector.broadcast %cst_103 : f32 to vector<8x128xf32>
    %271 = arith.addf %269, %270 : vector<8x128xf32>
    %272 = vector.extract_strided_slice %247 {offsets = [0, 384], sizes = [8, 128], strides = [1, 1]} : vector<8x512xf32> to vector<8x128xf32>
    %273 = math.tanh %272 : vector<8x128xf32>
    %274 = arith.mulf %255, %237 : vector<8x128xf32>
    %275 = arith.mulf %263, %273 : vector<8x128xf32>
    %276 = arith.addf %274, %275 : vector<8x128xf32>
    %277 = math.tanh %276 : vector<8x128xf32>
    %278 = arith.mulf %271, %277 : vector<8x128xf32>
    %c7_i32 = arith.constant 7 : i32
    %c8_i32_104 = arith.constant 8 : i32
    %279 = arith.muli %c7_i32, %c8_i32_104 : i32
    %280 = tpu.assume_multiple %279, 8 : i32
    %281 = arith.index_cast %280 : i32 to index
    %c0_105 = arith.constant 0 : index
    %282 = vector.load %arg6[%281, %c0_105] : memref<64x512xf32, #tpu.memory_space<vmem>>, vector<8x512xf32>
    %283 = arith.truncf %278 : vector<8x128xf32> to vector<8x128xbf16>
    %c0_106 = arith.constant 0 : index
    %c0_107 = arith.constant 0 : index
    %284 = vector.load %arg2[%c0_106, %c0_107] : memref<128x512xbf16, #tpu.memory_space<vmem>>, vector<128x512xbf16>
    %cst_108 = arith.constant dense<0.000000e+00> : vector<8x512xf32>
    %285 = tpu.matmul %283, %284, %cst_108 {dimension_numbers = #tpu.dot_dimension_numbers<[1], [0], [0], [1], [0, 0, 1, 1], [], []>} : vector<8x128xbf16>, vector<128x512xbf16>, vector<8x512xf32> -> vector<8x512xf32>
    %286 = arith.addf %282, %285 : vector<8x512xf32>
    %287 = vector.extract_strided_slice %286 {offsets = [0, 0], sizes = [8, 128], strides = [1, 1]} : vector<8x512xf32> to vector<8x128xf32>
    %cst_109 = arith.constant 5.000000e-01 : f32
    %288 = vector.broadcast %cst_109 : f32 to vector<8x128xf32>
    %289 = arith.mulf %288, %287 : vector<8x128xf32>
    %290 = math.tanh %289 : vector<8x128xf32>
    %cst_110 = arith.constant 5.000000e-01 : f32
    %291 = vector.broadcast %cst_110 : f32 to vector<8x128xf32>
    %292 = arith.mulf %291, %290 : vector<8x128xf32>
    %cst_111 = arith.constant 5.000000e-01 : f32
    %293 = vector.broadcast %cst_111 : f32 to vector<8x128xf32>
    %294 = arith.addf %292, %293 : vector<8x128xf32>
    %295 = vector.extract_strided_slice %286 {offsets = [0, 128], sizes = [8, 128], strides = [1, 1]} : vector<8x512xf32> to vector<8x128xf32>
    %cst_112 = arith.constant 5.000000e-01 : f32
    %296 = vector.broadcast %cst_112 : f32 to vector<8x128xf32>
    %297 = arith.mulf %296, %295 : vector<8x128xf32>
    %298 = math.tanh %297 : vector<8x128xf32>
    %cst_113 = arith.constant 5.000000e-01 : f32
    %299 = vector.broadcast %cst_113 : f32 to vector<8x128xf32>
    %300 = arith.mulf %299, %298 : vector<8x128xf32>
    %cst_114 = arith.constant 5.000000e-01 : f32
    %301 = vector.broadcast %cst_114 : f32 to vector<8x128xf32>
    %302 = arith.addf %300, %301 : vector<8x128xf32>
    %303 = vector.extract_strided_slice %286 {offsets = [0, 256], sizes = [8, 128], strides = [1, 1]} : vector<8x512xf32> to vector<8x128xf32>
    %cst_115 = arith.constant 5.000000e-01 : f32
    %304 = vector.broadcast %cst_115 : f32 to vector<8x128xf32>
    %305 = arith.mulf %304, %303 : vector<8x128xf32>
    %306 = math.tanh %305 : vector<8x128xf32>
    %cst_116 = arith.constant 5.000000e-01 : f32
    %307 = vector.broadcast %cst_116 : f32 to vector<8x128xf32>
    %308 = arith.mulf %307, %306 : vector<8x128xf32>
    %cst_117 = arith.constant 5.000000e-01 : f32
    %309 = vector.broadcast %cst_117 : f32 to vector<8x128xf32>
    %310 = arith.addf %308, %309 : vector<8x128xf32>
    %311 = vector.extract_strided_slice %286 {offsets = [0, 384], sizes = [8, 128], strides = [1, 1]} : vector<8x512xf32> to vector<8x128xf32>
    %312 = math.tanh %311 : vector<8x128xf32>
    %313 = arith.mulf %294, %276 : vector<8x128xf32>
    %314 = arith.mulf %302, %312 : vector<8x128xf32>
    %315 = arith.addf %313, %314 : vector<8x128xf32>
    %316 = math.tanh %315 : vector<8x128xf32>
    %317 = arith.mulf %310, %316 : vector<8x128xf32>
    %c8_i32_118 = arith.constant 8 : i32
    %318 = arith.truncf %317 : vector<8x128xf32> to vector<8x128xbf16>
    %c0_119 = arith.constant 0 : index
    %c0_120 = arith.constant 0 : index
    %319 = vector.load %arg3[%c0_119, %c0_120] : memref<128x128xbf16, #tpu.memory_space<vmem>>, vector<128x128xbf16>
    %cst_121 = arith.constant dense<0.000000e+00> : vector<8x128xf32>
    %320 = tpu.matmul %318, %319, %cst_121 {dimension_numbers = #tpu.dot_dimension_numbers<[1], [0], [0], [1], [0, 0, 1, 1], [], []>} : vector<8x128xbf16>, vector<128x128xbf16>, vector<8x128xf32> -> vector<8x128xf32>
    %c0_122 = arith.constant 0 : index
    %c0_123 = arith.constant 0 : index
    %321 = vector.load %arg4[%c0_122, %c0_123] : memref<8x128xf32, #tpu.memory_space<vmem>>, vector<8x128xf32>
    %322 = arith.addf %320, %321 : vector<8x128xf32>
    %c0_124 = arith.constant 0 : index
    %c0_125 = arith.constant 0 : index
    %323 = vector.load %arg5[%c0_124, %c0_125] : memref<8x128xf32, #tpu.memory_space<vmem>>, vector<8x128xf32>
    tpu.vector_store %arg5[%c0_124, %c0_125], %322 {strides = array<i32>} : memref<8x128xf32, #tpu.memory_space<vmem>>, vector<8x128xf32>,
    return
  }
}

</mosaic_0001>

<bundles_post_ra>
// kernel: lstm_classifier_forward.1
= control target key start
LH: loop header
LB: loop body
LE: loop exit
PB: predicated region body
PF: predicated region fallthrough
CT: control target
= control target key end

     0   :  { %10 = vsyncpa [#allocation4], 0  ;;  %s2267_s0 = inlined_call_operand.vmem [shape: bf16[64,29], index: 0, kind: input, shape index: {}]   ;;  %s2268_s1 = inlined_call_operand.vmem [shape: bf16[29,512], index: 1, kind: input, shape index: {}]   ;;  %s2269_s2 = inlined_call_operand.hbm [shape: bf16[128,512], index: 2, kind: input, shape index: {}]   ;;  %s2270_s3 = inlined_call_operand.hbm [shape: bf16[128,128], index: 3, kind: input, shape index: {}]   ;;  %s2271_s4 = inlined_call_operand.hbm [shape: f32[8,128], index: 4, kind: input, shape index: {}]   ;;  %s2272_s5 = inlined_call_operand.vmem [shape: f32[8,128], index: 5, kind: output, shape index: {}]  }
   0x1   :  { %11 = vsyncpa [#allocation6], 0  ;;  %s33_s20 = sshll.u32 %s2270_s3, 4  ;;  %s1698_s21 = smov [#allocation5]   ;;  %s34_s20 = int_to_ptr.hbm [resolvable:$true] %s33_s20 }
   0x2   :  { %s35_s22 = sshll.u32 %s1698_s21, 4  ;;  %s20_s25 = sshll.u32 %s2269_s2, 4  ;;  %s36_s22 = int_to_ptr.vmem [resolvable:$true] %s35_s22  ;;  %s21_s25 = int_to_ptr.hbm [resolvable:$true] %s20_s25 }
   0x3   :  { %s1699_s26 = smov 64   ;;  %s1700_s27 = smov 4  }
   0x4   :  { %41 = dma.hbm_to_vmem [thread:$0]  %s34_s20, 1024, %s36_s22, [#allocation6], %s1699_s26, %s1699_s26, %s1700_s27  }
   0x5   :  { %s1701_s28 = smov [#allocation3]   ;;  %s1702_s30 = smov 256  }
   0x6   :  { %s22_s29 = sshll.u32 %s1701_s28, 4  ;;  %s1703_s6 = smov 16   ;;  %s23_s29 = int_to_ptr.vmem [resolvable:$true] %s22_s29 }
   0x7   :  { %28 = dma.hbm_to_vmem [thread:$0]  %s21_s25, 4096, %s23_s29, [#allocation4], %s1702_s30, %s1702_s30, %s1703_s6  }
   0x8   :  { %s47_s8 = sshll.u32 %s2271_s4, 4  ;;  %s1704_s9 = smov [#allocation7]   ;;  %s48_s8 = int_to_ptr.hbm [resolvable:$true] %s47_s8 }
   0x9   :  { %s49_s10 = sshll.u32 %s1704_s9, 4  ;;  %s50_s10 = int_to_ptr.vmem [resolvable:$true] %s49_s10 }
   0xa   :  { %52 = dma.hbm_to_vmem [thread:$0]  %s48_s8, 128, %s50_s10, [#allocation6]  }
   0xb   :  { %1694 = dma.done.wait [#allocation4], 4096  }
   0xc   :  { %1695 = vsyncadd [#allocation4], 4294963200 }
   0xd   :  { %1696 = dma.done.wait [#allocation6], 1152  }
   0xe   :  { %1697 = vsyncadd [#allocation6], 4294966144  ;;  %vm151_vm0 = vcmask 1045504   ;;  %vm152_vm1 = vcmask 1046528   ;;  %v1705_v0 = vmov 65535   ;;  %v1791_v26 = vld [vmem:[%s2267_s0] sm:$0xff] }
   0xf   :  { %v153_v1 = vsel %vm151_vm0, 4294967295, %v1705_v0  ;;  %v1289_v3 = vld [vmem:[%s2268_s1 + $0x20] sm:$0xf]  ;;  %v1489_v4 = vld [vmem:[%s2268_s1 + $0x2c] sm:$0x70]  ;;  %vm138_vm2 = vcmask 236544  }
  0x10   :  { %v154_v2 = vsel %vm152_vm1, %v153_v1, 0  ;;  %v1297_v5 = vld [vmem:[%s2268_s1 + $0x28] sm:$0xf]  ;;  %v1290_v6 = vor.u32 %v1489_v4, %v1289_v3  ;;  %v1490_v7 = vld [vmem:[%s2268_s1 + $0x34] sm:$0x70] }
  0x11   :  { %v1488_v8 = vld [vmem:[%s2268_s1 + $0x2c] sm:$0xf]  ;;  %v1299_v9 = vld [vmem:[%s2268_s1 + $0x38] sm:$0x70]  ;;  %v1298_v10 = vor.u32 %v1490_v7, %v1297_v5  ;;  %v1273_v12 = vld [vmem:[%s2268_s1] sm:$0xf] }
  0x12   :  { %v1302_v11 = vor.u32 %v1488_v8, %v1299_v9  ;;  %v1485_v13 = vld [vmem:[%s2268_s1 + $0xc] sm:$0xf0]  ;;  %v1281_v14 = vld [vmem:[%s2268_s1 + $0x8] sm:$0xf]  ;;  %v156_v15 = vand.u32 %v1290_v6, %v154_v2  ;;  %v1486_v16 = vld [vmem:[%s2268_s1 + $0x14] sm:$0xf0] }
  0x13   :  { %v1484_v17 = vld [vmem:[%s2268_s1 + $0xc] sm:$0xf]  ;;  %v1283_v18 = vld [vmem:[%s2268_s1 + $0x18] sm:$0xf0]  ;;  %v162_v19 = vand.u32 %v1298_v10, %v154_v2  ;;  %v1487_v21 = vld [vmem:[%s2268_s1 + $0x24] sm:$0xf]  ;;  %v1274_v22 = vor.u32 %v1485_v13, %v1273_v12  ;;  %v1282_v24 = vor.u32 %v1486_v16, %v1281_v14 }
  0x14   :  { %v165_v20 = vand.u32 %v1302_v11, %v154_v2  ;;  %173 = vmatpush.bf16.msra.mxu0 %v156_v15  ;;  %1531 = vmatpush.bf16.msra.mxu1 %v156_v15  ;;  %v1291_v23 = vld [vmem:[%s2268_s1 + $0x30] sm:$0x70]  ;;  %v1286_v25 = vor.u32 %v1484_v17, %v1283_v18  ;;  %v1796_v27 = vld [vmem:[%s2267_s0 + $0x18] sm:$0xff]  ;;  %v1483_v29 = vld [vmem:[%s2268_s1 + $0x4] sm:$0xf] }
  0x15   :  { %231 = vmatpush.bf16.msra.mxu2 %v162_v19  ;;  %v1294_v28 = vor.u32 %v1487_v21, %v1291_v23  ;;  %v1520_v30 = vld [vmem:[#allocation3 + $0xec] sm:$0xf]  ;;  %v1443_v31 = vld [vmem:[#allocation3 + $0xf8] sm:$0xf0]  ;;  %v1433_v32 = vld [vmem:[#allocation3 + $0xe0] sm:$0xf] }
  0x16   :  { %260 = vmatpush.bf16.msra.mxu3 %v165_v20  ;;  %v1275_v34 = vld [vmem:[%s2268_s1 + $0x10] sm:$0xf0]  ;;  %v1519_v35 = vld [vmem:[#allocation3 + $0xe4] sm:$0xf]  ;;  %v1804_v36 = vor.u32 %v1520_v30, %v1443_v31  ;;  %v1521_v37 = vld [vmem:[#allocation3 + $0xec] sm:$0xf0] }
  0x17   :  { %v159_v33 = vand.u32 %v1294_v28, %v154_v2  ;;  %v1435_v38 = vld [vmem:[#allocation3 + $0xf0] sm:$0xf0]  ;;  %v1441_v39 = vld [vmem:[#allocation3 + $0xe8] sm:$0xf]  ;;  %v1522_v40 = vld [vmem:[#allocation3 + $0xf4] sm:$0xf0]  ;;  %v1806_v41 = vor.u32 %v1521_v37, %v1433_v32  ;;  %v1278_v45 = vor.u32 %v1483_v29, %v1275_v34 }
  0x18   :  { %174 = vmatpush.bf16.msra.mxu0 %v1274_v22  ;;  %1532 = vmatpush.bf16.msra.mxu1 %v1274_v22  ;;  %v1808_v42 = vor.u32 %v1522_v40, %v1441_v39  ;;  %v1516_v43 = vld [vmem:[#allocation3 + $0xcc] sm:$0xf]  ;;  %v1427_v44 = vld [vmem:[#allocation3 + $0xd8] sm:$0xf0]  ;;  %v1417_v46 = vld [vmem:[#allocation3 + $0xc0] sm:$0xf]  ;;  %v1817_v49 = vor.u32 %v1519_v35, %v1435_v38 }
  0x19   :  { %232 = vmatpush.bf16.msra.mxu2 %v1282_v24  ;;  %v1517_v47 = vld [vmem:[#allocation3 + $0xcc] sm:$0xf0]  ;;  %v1811_v48 = vor.u32 %v1516_v43, %v1427_v44  ;;  %v1425_v50 = vld [vmem:[#allocation3 + $0xc8] sm:$0xf]  ;;  %v1518_v51 = vld [vmem:[#allocation3 + $0xd4] sm:$0xf0] }
  0x1a   :  { %261 = vmatpush.bf16.msra.mxu3 %v1286_v25  ;;  %v1515_v52 = vld [vmem:[#allocation3 + $0xc4] sm:$0xf]  ;;  %v1419_v53 = vld [vmem:[#allocation3 + $0xd0] sm:$0xf0]  ;;  %v1824_v54 = vor.u32 %v1517_v47, %v1417_v46  ;;  %v1827_v55 = vor.u32 %v1518_v51, %v1425_v50  ;;  %v1512_v56 = vld [vmem:[#allocation3 + $0xac] sm:$0xf] }
  0x1b   :  { %1303 = vmatmul.msk.bf16.vlgmr.msra.gmra.mxu0 %vm138_vm2, %v1791_v26  ;;  %1306 = vmatmul.msk.bf16.vlgmr.msra.gmra.mxu1 %vm138_vm2, %v1796_v27  ;;  %v1411_v57 = vld [vmem:[#allocation3 + $0xb8] sm:$0xf0]  ;;  %v1401_v58 = vld [vmem:[#allocation3 + $0xa0] sm:$0xf]  ;;  %v1513_v59 = vld [vmem:[#allocation3 + $0xac] sm:$0xf0]  ;;  %v1833_v61 = vor.u32 %v1515_v52, %v1419_v53 }
  0x1c   :  { %202 = vmatpush.bf16.msrb.mxu1 %v159_v33  ;;  %1311 = vmatmul.msk.bf16.vlgmr.msra.gmra.mxu2 %vm138_vm2, %v1791_v26  ;;  %v1830_v60 = vor.u32 %v1512_v56, %v1411_v57  ;;  %v1511_v62 = vld [vmem:[#allocation3 + $0xa4] sm:$0xf]  ;;  %v1409_v63 = vld [vmem:[#allocation3 + $0xa8] sm:$0xf]  ;;  %v1514_v0 = vld [vmem:[#allocation3 + $0xb4] sm:$0xf0]  ;;  %v1836_v4 = vor.u32 %v1513_v59, %v1401_v58 }
  0x1d   :  { %1315 = vmatmul.msk.bf16.vlgmr.msra.gmra.mxu3 %vm138_vm2, %v1791_v26  ;;  %514 = vmatpush.bf16.msrb.mxu0 %v1806_v41  ;;  %v1403_v1 = vld [vmem:[#allocation3 + $0xb0] sm:$0xf0]  ;;  %v1508_v2 = vld [vmem:[#allocation3 + $0x8c] sm:$0xf]  ;;  %v1395_v3 = vld [vmem:[#allocation3 + $0x98] sm:$0xf0]  ;;  %v1839_v6 = vor.u32 %v1514_v0, %v1409_v63 }
  0x1e   :  { %553 = vmatpush.bf16.msrb.mxu3 %v1804_v36  ;;  %540 = vmatpush.bf16.msrb.mxu2 %v1808_v42  ;;  %v1385_v5 = vld [vmem:[#allocation3 + $0x80] sm:$0xf]  ;;  %v1509_v7 = vld [vmem:[#allocation3 + $0x8c] sm:$0xf0]  ;;  %v1842_v8 = vor.u32 %v1508_v2, %v1395_v3  ;;  %v1393_v9 = vld [vmem:[#allocation3 + $0x88] sm:$0xf]  ;;  %v1845_v11 = vor.u32 %v1511_v62, %v1403_v1 }
  0x1f   :  { %v1510_v10 = vld [vmem:[#allocation3 + $0x94] sm:$0xf0]  ;;  %v1848_v12 = vor.u32 %v1509_v7, %v1385_v5  ;;  %v1369_v13 = vld [vmem:[#allocation3 + $0x60] sm:$0xf]  ;;  %v1505_v15 = vld [vmem:[#allocation3 + $0x6c] sm:$0xf0] }
  0x20   :  { %203 = vmatpush.bf16.msrb.mxu1 %v1278_v45  ;;  %v1851_v14 = vor.u32 %v1510_v10, %v1393_v9  ;;  %v1507_v16 = vld [vmem:[#allocation3 + $0x84] sm:$0xf]  ;;  %v1387_v17 = vld [vmem:[#allocation3 + $0x90] sm:$0xf0]  ;;  %v1857_v18 = vld [vmem:[%s2267_s0 + $0x8] sm:$0xff]  ;;  %v1861_v19 = vor.u32 %v1505_v15, %v1369_v13 }
  0x21   :  { %515 = vmatpush.bf16.msrb.mxu0 %v1824_v54  ;;  %v1353_v20 = vld [vmem:[#allocation3 + $0x40] sm:$0xf]  ;;  %v1501_v21 = vld [vmem:[#allocation3 + $0x4c] sm:$0xf0]  ;;  %v1863_v22 = vor.u32 %v1507_v16, %v1387_v17  ;;  %v1504_v23 = vld [vmem:[#allocation3 + $0x6c] sm:$0xf] }
  0x22   :  { %554 = vmatpush.bf16.msrb.mxu3 %v1811_v48  ;;  %541 = vmatpush.bf16.msrb.mxu2 %v1827_v55  ;;  %v1379_v24 = vld [vmem:[#allocation3 + $0x78] sm:$0xf0]  ;;  %v1377_v25 = vld [vmem:[#allocation3 + $0x68] sm:$0xf]  ;;  %v1506_v29 = vld [vmem:[#allocation3 + $0x74] sm:$0xf0]  ;;  %v1879_v37 = vor.u32 %v1501_v21, %v1353_v20 }
  0x23   :  { %v1870_v28 = vor.u32 %v1504_v23, %v1379_v24  ;;  %v1337_v30 = vld [vmem:[#allocation3 + $0x20] sm:$0xf]  ;;  %v1497_v31 = vld [vmem:[#allocation3 + $0x2c] sm:$0xf0]  ;;  %v1503_v32 = vld [vmem:[#allocation3 + $0x64] sm:$0xf]  ;;  %v1876_v34 = vor.u32 %v1506_v29, %v1377_v25 }
  0x24   :  { %527 = vmatpush.bf16.msra.mxu1 %v1817_v49  ;;  %v1371_v33 = vld [vmem:[#allocation3 + $0x70] sm:$0xf0]  ;;  %v1361_v35 = vld [vmem:[#allocation3 + $0x48] sm:$0xf]  ;;  %v1502_v38 = vld [vmem:[#allocation3 + $0x54] sm:$0xf0]  ;;  %v1891_v53 = vor.u32 %v1497_v31, %v1337_v30 }
  0x25   :  { %516 = vmatpush.bf16.msrb.mxu0 %v1836_v4  ;;  %v1500_v39 = vld [vmem:[#allocation3 + $0x4c] sm:$0xf]  ;;  %v1363_v40 = vld [vmem:[#allocation3 + $0x58] sm:$0xf0]  ;;  %v1886_v43 = vor.u32 %v1502_v38, %v1361_v35  ;;  %v1499_v45 = vld [vmem:[#allocation3 + $0x44] sm:$0xf] }
  0x26   :  { %555 = vmatpush.bf16.msrb.mxu3 %v1830_v60  ;;  %542 = vmatpush.bf16.msrb.mxu2 %v1839_v6  ;;  %v1888_v44 = vor.u32 %v1500_v39, %v1363_v40  ;;  %v1355_v46 = vld [vmem:[#allocation3 + $0x50] sm:$0xf0]  ;;  %v1345_v47 = vld [vmem:[#allocation3 + $0x28] sm:$0xf]  ;;  %v1498_v50 = vld [vmem:[#allocation3 + $0x34] sm:$0xf0] }
  0x27   :  { %v1496_v51 = vld [vmem:[#allocation3 + $0x2c] sm:$0xf]  ;;  %v1347_v52 = vld [vmem:[#allocation3 + $0x38] sm:$0xf0]  ;;  %v1894_v56 = vor.u32 %v1499_v45, %v1355_v46  ;;  %v1321_v57 = vld [vmem:[#allocation3] sm:$0xf]  ;;  %v1898_v59 = vor.u32 %v1498_v50, %v1345_v47 }
  0x28   :  { %528 = vmatpush.bf16.msra.mxu1 %v1833_v61  ;;  %v1493_v58 = vld [vmem:[#allocation3 + $0xc] sm:$0xf0]  ;;  %v1900_v62 = vor.u32 %v1496_v51, %v1347_v52  ;;  %v1329_v63 = vld [vmem:[#allocation3 + $0x8] sm:$0xf]  ;;  %v1494_v0 = vld [vmem:[#allocation3 + $0x14] sm:$0xf0] }
  0x29   :  { %517 = vmatpush.bf16.msrb.mxu0 %v1848_v12  ;;  %v1492_v1 = vld [vmem:[#allocation3 + $0xc] sm:$0xf]  ;;  %v1331_v2 = vld [vmem:[#allocation3 + $0x18] sm:$0xf0]  ;;  %v1903_v3 = vor.u32 %v1493_v58, %v1321_v57  ;;  %v1908_v5 = vor.u32 %v1494_v0, %v1329_v63  ;;  %v1481_v9 = vld [vmem:[%s2267_s0 + $0x10] sm:$0xff] }
  0x2a   :  { %556 = vmatpush.bf16.msrb.mxu3 %v1842_v8  ;;  %543 = vmatpush.bf16.msrb.mxu2 %v1851_v14  ;;  %v1910_v7 = vor.u32 %v1492_v1, %v1331_v2  ;;  %v1495_v10 = vld [vmem:[#allocation3 + $0x24] sm:$0xf]  ;;  %v1339_v13 = vld [vmem:[#allocation3 + $0x30] sm:$0xf0] }
  0x2b   :  { %1304 = vmatmul.msk.bf16.gmra.mxu0 %vm138_vm2, %v1857_v18  ;;  %1307 = vmatmul.msk.bf16.vlgmr.msrb.gmra.mxu1 %vm138_vm2, %v1791_v26  ;;  %v1882_v26 = vor.u32 %v1503_v32, %v1371_v33  ;;  %v1923_v15 = vor.u32 %v1495_v10, %v1339_v13  ;;  %v1491_v16 = vld [vmem:[#allocation3 + $0x4] sm:$0xf]  ;;  %v1323_v17 = vld [vmem:[#allocation3 + $0x10] sm:$0xf0] }
  0x2c   :  { %529 = vmatpush.bf16.msra.mxu1 %v1845_v11  ;;  %1312 = vmatmul.msk.bf16.gmra.mxu2 %vm138_vm2, %v1857_v18  ;;  %v1928_v20 = vor.u32 %v1491_v16, %v1323_v17 }
  0x2d   :  { %1316 = vmatmul.msk.bf16.gmra.mxu3 %vm138_vm2, %v1857_v18  ;;  %518 = vmatpush.bf16.msrb.mxu0 %v1861_v19 }
  0x2e   :  { %557 = vmatpush.bf16.msrb.mxu3 %v1870_v28  ;;  %544 = vmatpush.bf16.msrb.mxu2 %v1876_v34 }
  0x30   :  { %530 = vmatpush.bf16.msra.mxu1 %v1863_v22 }
  0x31   :  { %519 = vmatpush.bf16.msrb.mxu0 %v1879_v37 }
  0x32   :  { %545 = vmatpush.bf16.msrb.mxu2 %v1886_v43  ;;  %558 = vmatpush.bf16.msrb.mxu3 %v1888_v44 }
  0x34   :  { %531 = vmatpush.bf16.msra.mxu1 %v1882_v26 }
  0x35   :  { %520 = vmatpush.bf16.msrb.mxu0 %v1891_v53 }
  0x36   :  { %546 = vmatpush.bf16.msrb.mxu2 %v1898_v59  ;;  %559 = vmatpush.bf16.msrb.mxu3 %v1900_v62 }
  0x38   :  { %532 = vmatpush.bf16.msra.mxu1 %v1894_v56 }
  0x39   :  { %521 = vmatpush.bf16.msrb.mxu0 %v1903_v3 }
  0x3a   :  { %547 = vmatpush.bf16.msrb.mxu2 %v1908_v5  ;;  %560 = vmatpush.bf16.msrb.mxu3 %v1910_v7 }
  0x3b   :  { %1305 = vmatmul.msk.bf16.gmra.mxu0 %vm138_vm2, %v1481_v9  ;;  %1308 = vmatmul.msk.bf16.gmra.mxu1 %vm138_vm2, %v1857_v18  ;;  %v1706_v18 = vmov 0  }
  0x3c   :  { %1313 = vmatmul.msk.bf16.gmra.mxu2 %vm138_vm2, %v1481_v9  ;;  %533 = vmatpush.bf16.msra.mxu1 %v1923_v15 }
  0x3d   :  { %1317 = vmatmul.msk.bf16.gmra.mxu3 %vm138_vm2, %v1481_v9  ;;  %596 = vmatpush.bf16.msra.mxu0 %v1806_v41 }
  0x3e   :  { %622 = vmatpush.bf16.msra.mxu2 %v1808_v42  ;;  %635 = vmatpush.bf16.msra.mxu3 %v1804_v36 }
  0x40   :  { %534 = vmatpush.bf16.msra.mxu1 %v1928_v20 }
  0x41   :  { %597 = vmatpush.bf16.msra.mxu0 %v1824_v54 }
  0x42   :  { %623 = vmatpush.bf16.msra.mxu2 %v1827_v55  ;;  %636 = vmatpush.bf16.msra.mxu3 %v1811_v48 }
  0x44   :  { %609 = vmatpush.bf16.msrb.mxu1 %v1817_v49 }
  0x45   :  { %598 = vmatpush.bf16.msra.mxu0 %v1836_v4 }
  0x46   :  { %624 = vmatpush.bf16.msra.mxu2 %v1839_v6  ;;  %637 = vmatpush.bf16.msra.mxu3 %v1830_v60 }
  0x48   :  { %610 = vmatpush.bf16.msrb.mxu1 %v1833_v61 }
  0x49   :  { %599 = vmatpush.bf16.msra.mxu0 %v1848_v12 }
  0x4a   :  { %625 = vmatpush.bf16.msra.mxu2 %v1851_v14  ;;  %638 = vmatpush.bf16.msra.mxu3 %v1842_v8 }
  0x4b   :  { %1309 = vmatmul.msk.bf16.gmra.mxu1 %vm138_vm2, %v1481_v9  ;;  %522 = vmatmul.bf16.vlgmr.msrb.gmra.mxu0 %v1706_v18 }
  0x4c   :  { %1314 = vmatmul.msk.bf16.gmra.mxu2 %vm138_vm2, %v1796_v27  ;;  %611 = vmatpush.bf16.msrb.mxu1 %v1845_v11 }
  0x4d   :  { %1318 = vmatmul.msk.bf16.gmra.mxu3 %vm138_vm2, %v1796_v27  ;;  %600 = vmatpush.bf16.msra.mxu0 %v1861_v19 }
  0x4e   :  { %626 = vmatpush.bf16.msra.mxu2 %v1876_v34  ;;  %639 = vmatpush.bf16.msra.mxu3 %v1870_v28 }
  0x50   :  { %612 = vmatpush.bf16.msrb.mxu1 %v1863_v22 }
  0x51   :  { %601 = vmatpush.bf16.msra.mxu0 %v1879_v37 }
  0x52   :  { %627 = vmatpush.bf16.msra.mxu2 %v1886_v43  ;;  %640 = vmatpush.bf16.msra.mxu3 %v1888_v44 }
  0x54   :  { %613 = vmatpush.bf16.msrb.mxu1 %v1882_v26 }
  0x55   :  { %602 = vmatpush.bf16.msra.mxu0 %v1891_v53 }
  0x56   :  { %628 = vmatpush.bf16.msra.mxu2 %v1898_v59  ;;  %641 = vmatpush.bf16.msra.mxu3 %v1900_v62 }
  0x58   :  { %614 = vmatpush.bf16.msrb.mxu1 %v1894_v56 }
  0x59   :  { %603 = vmatpush.bf16.msra.mxu0 %v1903_v3 }
  0x5a   :  { %629 = vmatpush.bf16.msra.mxu2 %v1908_v5  ;;  %642 = vmatpush.bf16.msra.mxu3 %v1910_v7 }
  0x5b   :  { %1310 = vmatmul.msk.bf16.gmra.mxu1 %vm138_vm2, %v1796_v27 }
  0x5c   :  { %548 = vmatmul.bf16.vlgmr.msrb.gmra.mxu2 %v1706_v18  ;;  %615 = vmatpush.bf16.msrb.mxu1 %v1923_v15 }
  0x5d   :  { %678 = vmatpush.bf16.msrb.mxu0 %v1806_v41  ;;  %561 = vmatmul.bf16.vlgmr.msrb.gmra.mxu3 %v1706_v18 }
  0x5e   :  { %704 = vmatpush.bf16.msrb.mxu2 %v1808_v42  ;;  %717 = vmatpush.bf16.msrb.mxu3 %v1804_v36 }
  0x60   :  { %616 = vmatpush.bf16.msrb.mxu1 %v1928_v20 }
  0x61   :  { %679 = vmatpush.bf16.msrb.mxu0 %v1824_v54 }
  0x62   :  { %705 = vmatpush.bf16.msrb.mxu2 %v1827_v55  ;;  %718 = vmatpush.bf16.msrb.mxu3 %v1811_v48 }
  0x65   :  { %680 = vmatpush.bf16.msrb.mxu0 %v1836_v4 }
  0x66   :  { %706 = vmatpush.bf16.msrb.mxu2 %v1839_v6  ;;  %719 = vmatpush.bf16.msrb.mxu3 %v1830_v60 }
  0x69   :  { %681 = vmatpush.bf16.msrb.mxu0 %v1848_v12 }
  0x6a   :  { %707 = vmatpush.bf16.msrb.mxu2 %v1851_v14  ;;  %720 = vmatpush.bf16.msrb.mxu3 %v1842_v8 }
  0x6b   :  { %535 = vmatmul.bf16.vlgmr.msra.gmra.mxu1 %v1706_v18 }
  0x6c   :  { %691 = vmatpush.bf16.msra.mxu1 %v1817_v49 }
  0x6d   :  { %682 = vmatpush.bf16.msrb.mxu0 %v1861_v19 }
  0x6e   :  { %708 = vmatpush.bf16.msrb.mxu2 %v1876_v34  ;;  %721 = vmatpush.bf16.msrb.mxu3 %v1870_v28 }
  0x70   :  { %692 = vmatpush.bf16.msra.mxu1 %v1833_v61 }
  0x71   :  { %683 = vmatpush.bf16.msrb.mxu0 %v1879_v37 }
  0x72   :  { %709 = vmatpush.bf16.msrb.mxu2 %v1886_v43  ;;  %722 = vmatpush.bf16.msrb.mxu3 %v1888_v44 }
  0x74   :  { %693 = vmatpush.bf16.msra.mxu1 %v1845_v11 }
  0x75   :  { %684 = vmatpush.bf16.msrb.mxu0 %v1891_v53 }
  0x76   :  { %710 = vmatpush.bf16.msrb.mxu2 %v1898_v59  ;;  %723 = vmatpush.bf16.msrb.mxu3 %v1900_v62 }
  0x78   :  { %694 = vmatpush.bf16.msra.mxu1 %v1863_v22 }
  0x79   :  { %685 = vmatpush.bf16.msrb.mxu0 %v1903_v3 }
  0x7a   :  { %711 = vmatpush.bf16.msrb.mxu2 %v1908_v5  ;;  %724 = vmatpush.bf16.msrb.mxu3 %v1910_v7 }
  0x7c   :  { %695 = vmatpush.bf16.msra.mxu1 %v1882_v26 }
  0x80   :  { %696 = vmatpush.bf16.msra.mxu1 %v1894_v56 }
  0x84   :  { %697 = vmatpush.bf16.msra.mxu1 %v1923_v15 }
  0x88   :  { %698 = vmatpush.bf16.msra.mxu1 %v1928_v20 }
  0x98   :  { %v176_v27 = vpop.f32.mrf.mxu0  ;;  %v2000_v21 = vpop.f32.mrf.mxu1 }
  0x99   :  { %2273 = vst [vmem:[#allocation10_spill] sm:$0xff] %v2000_v21 }
  0x9f   :  { %v234_v23 = vpop.f32.mrf.mxu2 }
  0xa0   :  { %v263_v24 = vpop.f32.mrf.mxu3  ;;  %v2002_v25 = vpop.f32.mrf.mxu0 }
  0xa1   :  { %v2004_v29 = vpop.f32.mrf.mxu1 }
  0xa2   :  { %2274 = vst [vmem:[#allocation11_spill] sm:$0xff] %v2004_v29 }
  0xa7   :  { %v2006_v30 = vpop.f32.mrf.mxu2 }
  0xa8   :  { %v2008_v31 = vpop.f32.mrf.mxu3  ;;  %v2010_v32 = vpop.f32.mrf.mxu0 }
  0xa9   :  { %v205_v33 = vpop.f32.mrf.mxu1 }
  0xaf   :  { %v2012_v35 = vpop.f32.mrf.mxu2 }
  0xb0   :  { %v2014_v38 = vpop.f32.mrf.mxu3  ;;  %v2016_v39 = vpop.f32.mrf.mxu0 }
  0xb1   :  { %v2018_v40 = vpop.f32.mrf.mxu1 }
  0xb7   :  { %v2020_v45 = vpop.f32.mrf.mxu2 }
  0xb8   :  { %2275 = vst [vmem:[#allocation12_spill] sm:$0xff] %v2020_v45  ;;  %v2022_v46 = vpop.f32.mrf.mxu3  ;;  %v2024_v47 = vpop.f32.mrf.mxu0 }
  0xb9   :  { %2276 = vst [vmem:[#allocation13_spill] sm:$0xff] %v2022_v46  ;;  %v2026_v50 = vpop.f32.mrf.mxu1 }
  0xba   :  { %2277 = vst [vmem:[#allocation14_spill] sm:$0xff] %v2024_v47 }
  0xbf   :  { %v2028_v51 = vpop.f32.mrf.mxu2 }
  0xc0   :  { %2278 = vst [vmem:[#allocation15_spill] sm:$0xff] %v2028_v51  ;;  %v2030_v52 = vpop.f32.mrf.mxu3  ;;  %v2032_v57 = vpop.f32.mrf.mxu0 }
  0xc1   :  { %2279 = vst [vmem:[#allocation16_spill] sm:$0xff] %v2030_v52  ;;  %v2034_v58 = vpop.f32.mrf.mxu1 }
  0xc2   :  { %2280 = vst [vmem:[#allocation17_spill] sm:$0xff] %v2032_v57 }
  0xc3   :  { %2281 = vst [vmem:[#allocation18_spill] sm:$0xff] %v2034_v58 }
  0xc7   :  { %v2036_v63 = vpop.f32.mrf.mxu2 }
  0xc8   :  { %2282 = vst [vmem:[#allocation19_spill] sm:$0xff] %v2036_v63  ;;  %v2038_v0 = vpop.f32.mrf.mxu3  ;;  %v523_v2 = vpop.f32.mrf.mxu0 }
  0xc9   :  { %2283 = vst [vmem:[#allocation20_spill] sm:$0xff] %v2038_v0  ;;  %v2040_v1 = vpop.f32.mrf.mxu1  ;;  %v566_v21 = vadd.f32 %v523_v2, %v176_v27 }
  0xca   :  { %2284 = vst [vmem:[#allocation21_spill] sm:$0xff] %v2040_v1 }
  0xcb   :  { %v570_v52 = vmul.f32 0.5, %v566_v21 }
  0xcd   :  { %1542 = vtanh.f32 %v570_v52 }
  0xcf   :  { %v2042_v9 = vpop.f32.mrf.mxu2 }
  0xd0   :  { %2285 = vst [vmem:[#allocation22_spill] sm:$0xff] %v2042_v9  ;;  %v2044_v10 = vpop.f32.mrf.mxu3  ;;  %v525_v16 = vpop.f32.mrf.mxu0 }
  0xd1   :  { %2286 = vst [vmem:[#allocation23_spill] sm:$0xff] %v2044_v10  ;;  %v2046_v13 = vpop.f32.mrf.mxu1 }
  0xd2   :  { %2287 = vst [vmem:[#allocation24_spill] sm:$0xff] %v2046_v13 }
  0xd3   :  { %v1543_v16 = vpop.eup %1542 }
  0xd7   :  { %v2048_v17 = vpop.f32.mrf.mxu2 }
  0xd8   :  { %2288 = vst [vmem:[#allocation25_spill] sm:$0xff] %v2048_v17  ;;  %v2050_v18 = vpop.f32.mrf.mxu3  ;;  %v572_v17 = vmul.f32 0.5, %v1543_v16 }
  0xd9   :  { %2289 = vst [vmem:[#allocation26_spill] sm:$0xff] %v2050_v18  ;;  %v2052_v29 = vpop.f32.mrf.mxu1 }
  0xda   :  { %2290 = vst [vmem:[#allocation27_spill] sm:$0xff] %v2052_v29  ;;  %v573_v2 = vadd.f32 0.5, %v572_v17 }
  0xdc   :  { %v583_v52 = vmul.f32 0.0, %v573_v2 }
  0xdf   :  { %v549_v63 = vpop.f32.mrf.mxu2 }
  0xe0   :  { %v562_v57 = vpop.f32.mrf.mxu3  ;;  %v568_v13 = vadd.f32 %v549_v63, %v234_v23 }
  0xe1   :  { %v2054_v0 = vpop.f32.mrf.mxu1  ;;  %v569_v46 = vadd.f32 %v562_v57, %v263_v24 }
  0xe2   :  { %2291 = vst [vmem:[#allocation28_spill] sm:$0xff] %v2054_v0  ;;  %v578_v18 = vmul.f32 0.5, %v568_v13 }
  0xe7   :  { %v551_v9 = vpop.f32.mrf.mxu2 }
  0xe8   :  { %v564_v51 = vpop.f32.mrf.mxu3 }
  0xe9   :  { %v536_v1 = vpop.f32.mrf.mxu1 }
  0xea   :  { %v567_v10 = vadd.f32 %v536_v1, %v205_v33 }
  0xec   :  { %v574_v47 = vmul.f32 0.5, %v567_v10 }
  0xee   :  { %1544 = vtanh.f32 %v574_v47 }
  0xef   :  { %1546 = vtanh.f32 %v569_v46 }
  0xf0   :  { %1548 = vtanh.f32 %v578_v18 }
  0xf1   :  { %v538_v45 = vpop.f32.mrf.mxu1 }
  0xf4   :  { %v1545_v27 = vpop.eup %1544 }
  0xf5   :  { %v576_v29 = vmul.f32 0.5, %v1545_v27  ;;  %v1547_v21 = vpop.eup %1546 }
  0xf6   :  { %v1549_v9 = vpop.eup %1548 }
  0xf7   :  { %v577_v0 = vadd.f32 0.5, %v576_v29  ;;  %v580_v23 = vmul.f32 0.5, %v1549_v9 }
  0xf9   :  { %v584_v51 = vmul.f32 %v1547_v21, %v577_v0  ;;  %v581_v24 = vadd.f32 0.5, %v580_v23 }
  0xfb   :  { %v2056_v58 = vadd.f32 %v584_v51, %v583_v52 }
  0xfd   :  { %1550 = vtanh.f32 %v2056_v58 }
 0x103   :  { %v1551_v33 = vpop.eup %1550 }
 0x104   :  { %v587_v47 = vmul.f32 %v1551_v33, %v581_v24 }
 0x106   :  { %v595_v57 = vpack.c.bf16 %v587_v47, %v587_v47 }
 0x108   :  { %604 = vmatmul.bf16.vlgmr.msra.gmra.mxu0 %v595_v57  ;;  %617 = vmatmul.bf16.vlgmr.msrb.gmra.mxu1 %v595_v57 }
 0x109   :  { %630 = vmatmul.bf16.vlgmr.msra.gmra.mxu2 %v595_v57  ;;  %643 = vmatmul.bf16.vlgmr.msra.gmra.mxu3 %v595_v57 }
 0x10a   :  { %760 = vmatpush.bf16.msra.mxu0 %v1806_v41  ;;  %773 = vmatpush.bf16.msrb.mxu1 %v1817_v49 }
 0x10b   :  { %786 = vmatpush.bf16.msra.mxu2 %v1808_v42  ;;  %799 = vmatpush.bf16.msra.mxu3 %v1804_v36 }
 0x10e   :  { %761 = vmatpush.bf16.msra.mxu0 %v1824_v54  ;;  %774 = vmatpush.bf16.msrb.mxu1 %v1833_v61 }
 0x10f   :  { %787 = vmatpush.bf16.msra.mxu2 %v1827_v55  ;;  %800 = vmatpush.bf16.msra.mxu3 %v1811_v48 }
 0x112   :  { %762 = vmatpush.bf16.msra.mxu0 %v1836_v4  ;;  %775 = vmatpush.bf16.msrb.mxu1 %v1845_v11 }
 0x113   :  { %788 = vmatpush.bf16.msra.mxu2 %v1839_v6  ;;  %801 = vmatpush.bf16.msra.mxu3 %v1830_v60 }
 0x116   :  { %763 = vmatpush.bf16.msra.mxu0 %v1848_v12  ;;  %776 = vmatpush.bf16.msrb.mxu1 %v1863_v22 }
 0x117   :  { %789 = vmatpush.bf16.msra.mxu2 %v1851_v14  ;;  %802 = vmatpush.bf16.msra.mxu3 %v1842_v8 }
 0x11a   :  { %764 = vmatpush.bf16.msra.mxu0 %v1861_v19  ;;  %777 = vmatpush.bf16.msrb.mxu1 %v1882_v26 }
 0x11b   :  { %790 = vmatpush.bf16.msra.mxu2 %v1876_v34  ;;  %803 = vmatpush.bf16.msra.mxu3 %v1870_v28 }
 0x11e   :  { %765 = vmatpush.bf16.msra.mxu0 %v1879_v37  ;;  %778 = vmatpush.bf16.msrb.mxu1 %v1894_v56 }
 0x11f   :  { %791 = vmatpush.bf16.msra.mxu2 %v1886_v43  ;;  %804 = vmatpush.bf16.msra.mxu3 %v1888_v44 }
 0x122   :  { %766 = vmatpush.bf16.msra.mxu0 %v1891_v53  ;;  %779 = vmatpush.bf16.msrb.mxu1 %v1923_v15 }
 0x123   :  { %792 = vmatpush.bf16.msra.mxu2 %v1898_v59  ;;  %805 = vmatpush.bf16.msra.mxu3 %v1900_v62 }
 0x126   :  { %767 = vmatpush.bf16.msra.mxu0 %v1903_v3  ;;  %780 = vmatpush.bf16.msrb.mxu1 %v1928_v20 }
 0x127   :  { %793 = vmatpush.bf16.msra.mxu2 %v1908_v5  ;;  %806 = vmatpush.bf16.msra.mxu3 %v1910_v7 }
 0x185   :  { %v605_v29 = vpop.f32.mrf.mxu0  ;;  %v618_v45 = vpop.f32.mrf.mxu1 }
 0x186   :  { %v648_v46 = vadd.f32 %v605_v29, %v2002_v25  ;;  %v649_v63 = vadd.f32 %v618_v45, %v2018_v40 }
 0x188   :  { %v652_v0 = vmul.f32 0.5, %v648_v46  ;;  %v656_v1 = vmul.f32 0.5, %v649_v63 }
 0x18a   :  { %1552 = vtanh.f32 %v652_v0 }
 0x18b   :  { %1554 = vtanh.f32 %v656_v1 }
 0x18c   :  { %v631_v10 = vpop.f32.mrf.mxu2  ;;  %v644_v13 = vpop.f32.mrf.mxu3 }
 0x18d   :  { %v650_v17 = vadd.f32 %v631_v10, %v2006_v30  ;;  %v651_v18 = vadd.f32 %v644_v13, %v2008_v31  ;;  %v607_v16 = vpop.f32.mrf.mxu0  ;;  %v620_v27 = vpop.f32.mrf.mxu1 }
 0x18f   :  { %v660_v2 = vmul.f32 0.5, %v650_v17  ;;  %1556 = vtanh.f32 %v651_v18 }
 0x190   :  { %v1553_v21 = vpop.eup %1552 }
 0x191   :  { %v1555_v52 = vpop.eup %1554  ;;  %v654_v51 = vmul.f32 0.5, %v1553_v21  ;;  %1558 = vtanh.f32 %v660_v2 }
 0x192   :  { %v658_v25 = vmul.f32 0.5, %v1555_v52 }
 0x193   :  { %v655_v40 = vadd.f32 0.5, %v654_v51 }
 0x194   :  { %v659_v9 = vadd.f32 0.5, %v658_v25  ;;  %v633_v23 = vpop.f32.mrf.mxu2  ;;  %v646_v24 = vpop.f32.mrf.mxu3 }
 0x195   :  { %v1557_v33 = vpop.eup %1556  ;;  %v665_v47 = vmul.f32 %v655_v40, %v2056_v58 }
 0x196   :  { %v666_v57 = vmul.f32 %v1557_v33, %v659_v9 }
 0x197   :  { %v1559_v30 = vpop.eup %1558 }
 0x198   :  { %v2096_v29 = vadd.f32 %v666_v57, %v665_v47  ;;  %v662_v31 = vmul.f32 0.5, %v1559_v30 }
 0x19a   :  { %1560 = vtanh.f32 %v2096_v29  ;;  %v663_v45 = vadd.f32 0.5, %v662_v31 }
 0x1a0   :  { %v1561_v46 = vpop.eup %1560 }
 0x1a1   :  { %v669_v63 = vmul.f32 %v1561_v46, %v663_v45 }
 0x1a3   :  { %v677_v0 = vpack.c.bf16 %v669_v63, %v669_v63 }
 0x1a5   :  { %686 = vmatmul.bf16.vlgmr.msrb.gmra.mxu0 %v677_v0  ;;  %699 = vmatmul.bf16.vlgmr.msra.gmra.mxu1 %v677_v0 }
 0x1a6   :  { %712 = vmatmul.bf16.vlgmr.msrb.gmra.mxu2 %v677_v0  ;;  %725 = vmatmul.bf16.vlgmr.msrb.gmra.mxu3 %v677_v0 }
 0x1a7   :  { %842 = vmatpush.bf16.msrb.mxu0 %v1806_v41  ;;  %855 = vmatpush.bf16.msra.mxu1 %v1817_v49 }
 0x1a8   :  { %868 = vmatpush.bf16.msrb.mxu2 %v1808_v42  ;;  %881 = vmatpush.bf16.msrb.mxu3 %v1804_v36 }
 0x1ab   :  { %843 = vmatpush.bf16.msrb.mxu0 %v1824_v54  ;;  %856 = vmatpush.bf16.msra.mxu1 %v1833_v61 }
 0x1ac   :  { %869 = vmatpush.bf16.msrb.mxu2 %v1827_v55  ;;  %882 = vmatpush.bf16.msrb.mxu3 %v1811_v48 }
 0x1af   :  { %844 = vmatpush.bf16.msrb.mxu0 %v1836_v4  ;;  %857 = vmatpush.bf16.msra.mxu1 %v1845_v11 }
 0x1b0   :  { %870 = vmatpush.bf16.msrb.mxu2 %v1839_v6  ;;  %883 = vmatpush.bf16.msrb.mxu3 %v1830_v60 }
 0x1b3   :  { %845 = vmatpush.bf16.msrb.mxu0 %v1848_v12  ;;  %858 = vmatpush.bf16.msra.mxu1 %v1863_v22 }
 0x1b4   :  { %871 = vmatpush.bf16.msrb.mxu2 %v1851_v14  ;;  %884 = vmatpush.bf16.msrb.mxu3 %v1842_v8 }
 0x1b7   :  { %846 = vmatpush.bf16.msrb.mxu0 %v1861_v19  ;;  %859 = vmatpush.bf16.msra.mxu1 %v1882_v26 }
 0x1b8   :  { %872 = vmatpush.bf16.msrb.mxu2 %v1876_v34  ;;  %885 = vmatpush.bf16.msrb.mxu3 %v1870_v28 }
 0x1bb   :  { %847 = vmatpush.bf16.msrb.mxu0 %v1879_v37  ;;  %860 = vmatpush.bf16.msra.mxu1 %v1894_v56 }
 0x1bc   :  { %873 = vmatpush.bf16.msrb.mxu2 %v1886_v43  ;;  %886 = vmatpush.bf16.msrb.mxu3 %v1888_v44 }
 0x1bf   :  { %848 = vmatpush.bf16.msrb.mxu0 %v1891_v53  ;;  %861 = vmatpush.bf16.msra.mxu1 %v1923_v15 }
 0x1c0   :  { %874 = vmatpush.bf16.msrb.mxu2 %v1898_v59  ;;  %887 = vmatpush.bf16.msrb.mxu3 %v1900_v62 }
 0x1c3   :  { %849 = vmatpush.bf16.msrb.mxu0 %v1903_v3  ;;  %862 = vmatpush.bf16.msra.mxu1 %v1928_v20 }
 0x1c4   :  { %875 = vmatpush.bf16.msrb.mxu2 %v1908_v5  ;;  %888 = vmatpush.bf16.msrb.mxu3 %v1910_v7 }
 0x222   :  { %v687_v58 = vpop.f32.mrf.mxu0  ;;  %v700_v1 = vpop.f32.mrf.mxu1 }
 0x223   :  { %v730_v10 = vadd.f32 %v687_v58, %v2010_v32  ;;  %v731_v13 = vadd.f32 %v700_v1, %v2026_v50 }
 0x225   :  { %v734_v17 = vmul.f32 0.5, %v730_v10  ;;  %v738_v18 = vmul.f32 0.5, %v731_v13  ;;  %v2292_v13 = vld [vmem:[#allocation18_spill] sm:$0xff] }
 0x227   :  { %1562 = vtanh.f32 %v734_v17 }
 0x228   :  { %1564 = vtanh.f32 %v738_v18 }
 0x229   :  { %v713_v16 = vpop.f32.mrf.mxu2  ;;  %v726_v27 = vpop.f32.mrf.mxu3 }
 0x22a   :  { %v732_v2 = vadd.f32 %v713_v16, %v2012_v35  ;;  %v733_v21 = vadd.f32 %v726_v27, %v2014_v38  ;;  %v689_v52 = vpop.f32.mrf.mxu0  ;;  %v702_v51 = vpop.f32.mrf.mxu1 }
 0x22b   :  { %v2294_v51 = vld [vmem:[#allocation13_spill] sm:$0xff] }
 0x22c   :  { %v742_v25 = vmul.f32 0.5, %v732_v2  ;;  %1566 = vtanh.f32 %v733_v21  ;;  %v2293_v21 = vld [vmem:[#allocation12_spill] sm:$0xff] }
 0x22d   :  { %v1563_v40 = vpop.eup %1562 }
 0x22e   :  { %v1565_v9 = vpop.eup %1564  ;;  %v736_v23 = vmul.f32 0.5, %v1563_v40  ;;  %1568 = vtanh.f32 %v742_v25 }
 0x22f   :  { %v740_v32 = vmul.f32 0.5, %v1565_v9 }
 0x230   :  { %v737_v50 = vadd.f32 0.5, %v736_v23 }
 0x231   :  { %v741_v24 = vadd.f32 0.5, %v740_v32  ;;  %v715_v33 = vpop.f32.mrf.mxu2  ;;  %v728_v47 = vpop.f32.mrf.mxu3 }
 0x232   :  { %v1567_v57 = vpop.eup %1566  ;;  %v747_v30 = vmul.f32 %v737_v50, %v2096_v29 }
 0x233   :  { %v748_v31 = vmul.f32 %v1567_v57, %v741_v24 }
 0x234   :  { %v1569_v35 = vpop.eup %1568 }
 0x235   :  { %v2136_v45 = vadd.f32 %v748_v31, %v747_v30  ;;  %v744_v38 = vmul.f32 0.5, %v1569_v35 }
 0x237   :  { %1570 = vtanh.f32 %v2136_v45  ;;  %v745_v46 = vadd.f32 0.5, %v744_v38 }
 0x23d   :  { %v1571_v63 = vpop.eup %1570 }
 0x23e   :  { %v751_v0 = vmul.f32 %v1571_v63, %v745_v46 }
 0x240   :  { %v759_v58 = vpack.c.bf16 %v751_v0, %v751_v0 }
 0x242   :  { %768 = vmatmul.bf16.vlgmr.msra.gmra.mxu0 %v759_v58  ;;  %781 = vmatmul.bf16.vlgmr.msrb.gmra.mxu1 %v759_v58 }
 0x243   :  { %794 = vmatmul.bf16.vlgmr.msra.gmra.mxu2 %v759_v58  ;;  %807 = vmatmul.bf16.vlgmr.msra.gmra.mxu3 %v759_v58 }
 0x244   :  { %924 = vmatpush.bf16.msra.mxu0 %v1806_v41  ;;  %937 = vmatpush.bf16.msrb.mxu1 %v1817_v49 }
 0x245   :  { %950 = vmatpush.bf16.msra.mxu2 %v1808_v42  ;;  %963 = vmatpush.bf16.msra.mxu3 %v1804_v36 }
 0x248   :  { %925 = vmatpush.bf16.msra.mxu0 %v1824_v54  ;;  %938 = vmatpush.bf16.msrb.mxu1 %v1833_v61 }
 0x249   :  { %951 = vmatpush.bf16.msra.mxu2 %v1827_v55  ;;  %964 = vmatpush.bf16.msra.mxu3 %v1811_v48 }
 0x24c   :  { %926 = vmatpush.bf16.msra.mxu0 %v1836_v4  ;;  %939 = vmatpush.bf16.msrb.mxu1 %v1845_v11 }
 0x24d   :  { %952 = vmatpush.bf16.msra.mxu2 %v1839_v6  ;;  %965 = vmatpush.bf16.msra.mxu3 %v1830_v60 }
 0x250   :  { %927 = vmatpush.bf16.msra.mxu0 %v1848_v12  ;;  %940 = vmatpush.bf16.msrb.mxu1 %v1863_v22 }
 0x251   :  { %953 = vmatpush.bf16.msra.mxu2 %v1851_v14  ;;  %966 = vmatpush.bf16.msra.mxu3 %v1842_v8 }
 0x254   :  { %928 = vmatpush.bf16.msra.mxu0 %v1861_v19  ;;  %941 = vmatpush.bf16.msrb.mxu1 %v1882_v26 }
 0x255   :  { %954 = vmatpush.bf16.msra.mxu2 %v1876_v34  ;;  %967 = vmatpush.bf16.msra.mxu3 %v1870_v28 }
 0x258   :  { %929 = vmatpush.bf16.msra.mxu0 %v1879_v37  ;;  %942 = vmatpush.bf16.msrb.mxu1 %v1894_v56 }
 0x259   :  { %955 = vmatpush.bf16.msra.mxu2 %v1886_v43  ;;  %968 = vmatpush.bf16.msra.mxu3 %v1888_v44 }
 0x25c   :  { %930 = vmatpush.bf16.msra.mxu0 %v1891_v53  ;;  %943 = vmatpush.bf16.msrb.mxu1 %v1923_v15 }
 0x25d   :  { %956 = vmatpush.bf16.msra.mxu2 %v1898_v59  ;;  %969 = vmatpush.bf16.msra.mxu3 %v1900_v62 }
 0x260   :  { %931 = vmatpush.bf16.msra.mxu0 %v1903_v3  ;;  %944 = vmatpush.bf16.msrb.mxu1 %v1928_v20 }
 0x261   :  { %957 = vmatpush.bf16.msra.mxu2 %v1908_v5  ;;  %970 = vmatpush.bf16.msra.mxu3 %v1910_v7 }
 0x2bf   :  { %v769_v29 = vpop.f32.mrf.mxu0  ;;  %v782_v1 = vpop.f32.mrf.mxu1 }
 0x2c0   :  { %v812_v10 = vadd.f32 %v769_v29, %v2016_v39  ;;  %v813_v17 = vadd.f32 %v782_v1, %v2292_v13 }
 0x2c2   :  { %v816_v18 = vmul.f32 0.5, %v812_v10  ;;  %v820_v16 = vmul.f32 0.5, %v813_v17  ;;  %v2295_v17 = vld [vmem:[#allocation14_spill] sm:$0xff] }
 0x2c4   :  { %1572 = vtanh.f32 %v816_v18 }
 0x2c5   :  { %1574 = vtanh.f32 %v820_v16  ;;  %v2296_v16 = vld [vmem:[#allocation21_spill] sm:$0xff] }
 0x2c6   :  { %v795_v27 = vpop.f32.mrf.mxu2  ;;  %v808_v2 = vpop.f32.mrf.mxu3 }
 0x2c7   :  { %v814_v52 = vadd.f32 %v795_v27, %v2293_v21  ;;  %v815_v25 = vadd.f32 %v808_v2, %v2294_v51  ;;  %v771_v40 = vpop.f32.mrf.mxu0  ;;  %v784_v9 = vpop.f32.mrf.mxu1 }
 0x2c8   :  { %v2298_v9 = vld [vmem:[#allocation16_spill] sm:$0xff] }
 0x2c9   :  { %v824_v23 = vmul.f32 0.5, %v814_v52  ;;  %1576 = vtanh.f32 %v815_v25  ;;  %v2297_v25 = vld [vmem:[#allocation15_spill] sm:$0xff] }
 0x2ca   :  { %v1573_v32 = vpop.eup %1572 }
 0x2cb   :  { %v1575_v50 = vpop.eup %1574  ;;  %v818_v24 = vmul.f32 0.5, %v1573_v32  ;;  %1578 = vtanh.f32 %v824_v23 }
 0x2cc   :  { %v822_v39 = vmul.f32 0.5, %v1575_v50 }
 0x2cd   :  { %v819_v33 = vadd.f32 0.5, %v818_v24 }
 0x2ce   :  { %v823_v47 = vadd.f32 0.5, %v822_v39  ;;  %v797_v57 = vpop.f32.mrf.mxu2  ;;  %v810_v30 = vpop.f32.mrf.mxu3 }
 0x2cf   :  { %v1577_v31 = vpop.eup %1576  ;;  %v829_v35 = vmul.f32 %v819_v33, %v2136_v45 }
 0x2d0   :  { %v830_v38 = vmul.f32 %v1577_v31, %v823_v47 }
 0x2d1   :  { %v1579_v46 = vpop.eup %1578 }
 0x2d2   :  { %v2176_v63 = vadd.f32 %v830_v38, %v829_v35  ;;  %v826_v0 = vmul.f32 0.5, %v1579_v46 }
 0x2d4   :  { %1580 = vtanh.f32 %v2176_v63  ;;  %v827_v58 = vadd.f32 0.5, %v826_v0 }
 0x2da   :  { %v1581_v29 = vpop.eup %1580 }
 0x2db   :  { %v833_v1 = vmul.f32 %v1581_v29, %v827_v58 }
 0x2dd   :  { %v841_v10 = vpack.c.bf16 %v833_v1, %v833_v1 }
 0x2df   :  { %850 = vmatmul.bf16.vlgmr.msrb.gmra.mxu0 %v841_v10  ;;  %863 = vmatmul.bf16.vlgmr.msra.gmra.mxu1 %v841_v10 }
 0x2e0   :  { %876 = vmatmul.bf16.vlgmr.msrb.gmra.mxu2 %v841_v10  ;;  %889 = vmatmul.bf16.vlgmr.msrb.gmra.mxu3 %v841_v10 }
 0x2e1   :  { %1006 = vmatpush.bf16.msrb.mxu0 %v1806_v41  ;;  %1019 = vmatpush.bf16.msra.mxu1 %v1817_v49 }
 0x2e2   :  { %1032 = vmatpush.bf16.msrb.mxu2 %v1808_v42  ;;  %1045 = vmatpush.bf16.msrb.mxu3 %v1804_v36 }
 0x2e5   :  { %1007 = vmatpush.bf16.msrb.mxu0 %v1824_v54  ;;  %1020 = vmatpush.bf16.msra.mxu1 %v1833_v61 }
 0x2e6   :  { %1033 = vmatpush.bf16.msrb.mxu2 %v1827_v55  ;;  %1046 = vmatpush.bf16.msrb.mxu3 %v1811_v48 }
 0x2e9   :  { %1008 = vmatpush.bf16.msrb.mxu0 %v1836_v4  ;;  %1021 = vmatpush.bf16.msra.mxu1 %v1845_v11 }
 0x2ea   :  { %1034 = vmatpush.bf16.msrb.mxu2 %v1839_v6  ;;  %1047 = vmatpush.bf16.msrb.mxu3 %v1830_v60 }
 0x2ed   :  { %1009 = vmatpush.bf16.msrb.mxu0 %v1848_v12  ;;  %1022 = vmatpush.bf16.msra.mxu1 %v1863_v22 }
 0x2ee   :  { %1035 = vmatpush.bf16.msrb.mxu2 %v1851_v14  ;;  %1048 = vmatpush.bf16.msrb.mxu3 %v1842_v8 }
 0x2f1   :  { %1010 = vmatpush.bf16.msrb.mxu0 %v1861_v19  ;;  %1023 = vmatpush.bf16.msra.mxu1 %v1882_v26 }
 0x2f2   :  { %1036 = vmatpush.bf16.msrb.mxu2 %v1876_v34  ;;  %1049 = vmatpush.bf16.msrb.mxu3 %v1870_v28 }
 0x2f5   :  { %1011 = vmatpush.bf16.msrb.mxu0 %v1879_v37  ;;  %1024 = vmatpush.bf16.msra.mxu1 %v1894_v56 }
 0x2f6   :  { %1037 = vmatpush.bf16.msrb.mxu2 %v1886_v43  ;;  %1050 = vmatpush.bf16.msrb.mxu3 %v1888_v44 }
 0x2f9   :  { %1012 = vmatpush.bf16.msrb.mxu0 %v1891_v53  ;;  %1025 = vmatpush.bf16.msra.mxu1 %v1923_v15 }
 0x2fa   :  { %1038 = vmatpush.bf16.msrb.mxu2 %v1898_v59  ;;  %1051 = vmatpush.bf16.msrb.mxu3 %v1900_v62 }
 0x2fd   :  { %1013 = vmatpush.bf16.msrb.mxu0 %v1903_v3  ;;  %1026 = vmatpush.bf16.msra.mxu1 %v1928_v20 }
 0x2fe   :  { %1039 = vmatpush.bf16.msrb.mxu2 %v1908_v5  ;;  %1052 = vmatpush.bf16.msrb.mxu3 %v1910_v7 }
 0x35c   :  { %v851_v45 = vpop.f32.mrf.mxu0  ;;  %v864_v13 = vpop.f32.mrf.mxu1 }
 0x35d   :  { %v894_v18 = vadd.f32 %v851_v45, %v2295_v17  ;;  %v895_v27 = vadd.f32 %v864_v13, %v2296_v16 }
 0x35f   :  { %v898_v2 = vmul.f32 0.5, %v894_v18  ;;  %v902_v21 = vmul.f32 0.5, %v895_v27 }
 0x361   :  { %1582 = vtanh.f32 %v898_v2 }
 0x362   :  { %1584 = vtanh.f32 %v902_v21 }
 0x363   :  { %v877_v52 = vpop.f32.mrf.mxu2  ;;  %v890_v51 = vpop.f32.mrf.mxu3 }
 0x364   :  { %v896_v40 = vadd.f32 %v877_v52, %v2297_v25  ;;  %v897_v23 = vadd.f32 %v890_v51, %v2298_v9  ;;  %v853_v32 = vpop.f32.mrf.mxu0  ;;  %v866_v50 = vpop.f32.mrf.mxu1  ;;  %v2303_v52 = vld [vmem:[#allocation10_spill] sm:$0xff]  ;;  %v2304_v25 = vld [vmem:[#allocation27_spill] sm:$0xff] }
 0x366   :  { %v906_v24 = vmul.f32 0.5, %v896_v40  ;;  %1586 = vtanh.f32 %v897_v23 }
 0x367   :  { %v1583_v39 = vpop.eup %1582 }
 0x368   :  { %v1585_v33 = vpop.eup %1584  ;;  %v900_v47 = vmul.f32 0.5, %v1583_v39  ;;  %1588 = vtanh.f32 %v906_v24  ;;  %v2305_v24 = vld [vmem:[#allocation22_spill] sm:$0xff] }
 0x369   :  { %v904_v57 = vmul.f32 0.5, %v1585_v33  ;;  %v2306_v33 = vld [vmem:[#allocation23_spill] sm:$0xff] }
 0x36a   :  { %v901_v30 = vadd.f32 0.5, %v900_v47 }
 0x36b   :  { %v905_v31 = vadd.f32 0.5, %v904_v57  ;;  %v879_v35 = vpop.f32.mrf.mxu2  ;;  %v892_v38 = vpop.f32.mrf.mxu3 }
 0x36c   :  { %v1587_v46 = vpop.eup %1586  ;;  %v911_v0 = vmul.f32 %v901_v30, %v2176_v63 }
 0x36d   :  { %v912_v58 = vmul.f32 %v1587_v46, %v905_v31 }
 0x36e   :  { %v1589_v29 = vpop.eup %1588 }
 0x36f   :  { %v2216_v1 = vadd.f32 %v912_v58, %v911_v0  ;;  %v908_v10 = vmul.f32 0.5, %v1589_v29 }
 0x371   :  { %1590 = vtanh.f32 %v2216_v1  ;;  %v909_v45 = vadd.f32 0.5, %v908_v10 }
 0x377   :  { %v1591_v13 = vpop.eup %1590 }
 0x378   :  { %v915_v17 = vmul.f32 %v1591_v13, %v909_v45 }
 0x37a   :  { %v923_v18 = vpack.c.bf16 %v915_v17, %v915_v17 }
 0x37c   :  { %932 = vmatmul.bf16.vlgmr.msra.gmra.mxu0 %v923_v18  ;;  %945 = vmatmul.bf16.vlgmr.msrb.gmra.mxu1 %v923_v18 }
 0x37d   :  { %958 = vmatmul.bf16.vlgmr.msra.gmra.mxu2 %v923_v18  ;;  %971 = vmatmul.bf16.vlgmr.msra.gmra.mxu3 %v923_v18 }
 0x37e   :  { %1088 = vmatpush.bf16.msra.mxu0 %v1806_v41  ;;  %1101 = vmatpush.bf16.msrb.mxu1 %v1817_v49  ;;  %v2300_v49 = vld [vmem:[#allocation24_spill] sm:$0xff] }
 0x37f   :  { %1114 = vmatpush.bf16.msra.mxu2 %v1808_v42  ;;  %1127 = vmatpush.bf16.msra.mxu3 %v1804_v36  ;;  %v2299_v42 = vld [vmem:[#allocation17_spill] sm:$0xff] }
 0x382   :  { %1089 = vmatpush.bf16.msra.mxu0 %v1824_v54  ;;  %1102 = vmatpush.bf16.msrb.mxu1 %v1833_v61 }
 0x383   :  { %1115 = vmatpush.bf16.msra.mxu2 %v1827_v55  ;;  %1128 = vmatpush.bf16.msra.mxu3 %v1811_v48 }
 0x386   :  { %1090 = vmatpush.bf16.msra.mxu0 %v1836_v4  ;;  %1103 = vmatpush.bf16.msrb.mxu1 %v1845_v11  ;;  %v2302_v11 = vld [vmem:[#allocation20_spill] sm:$0xff] }
 0x387   :  { %1116 = vmatpush.bf16.msra.mxu2 %v1839_v6  ;;  %1129 = vmatpush.bf16.msra.mxu3 %v1830_v60  ;;  %v2301_v6 = vld [vmem:[#allocation19_spill] sm:$0xff] }
 0x38a   :  { %1091 = vmatpush.bf16.msra.mxu0 %v1848_v12  ;;  %1104 = vmatpush.bf16.msrb.mxu1 %v1863_v22 }
 0x38b   :  { %1117 = vmatpush.bf16.msra.mxu2 %v1851_v14  ;;  %1130 = vmatpush.bf16.msra.mxu3 %v1842_v8 }
 0x38e   :  { %1092 = vmatpush.bf16.msra.mxu0 %v1861_v19  ;;  %1105 = vmatpush.bf16.msrb.mxu1 %v1882_v26 }
 0x38f   :  { %1118 = vmatpush.bf16.msra.mxu2 %v1876_v34  ;;  %1131 = vmatpush.bf16.msra.mxu3 %v1870_v28 }
 0x392   :  { %1093 = vmatpush.bf16.msra.mxu0 %v1879_v37  ;;  %1106 = vmatpush.bf16.msrb.mxu1 %v1894_v56 }
 0x393   :  { %1119 = vmatpush.bf16.msra.mxu2 %v1886_v43  ;;  %1132 = vmatpush.bf16.msra.mxu3 %v1888_v44 }
 0x396   :  { %1094 = vmatpush.bf16.msra.mxu0 %v1891_v53  ;;  %1107 = vmatpush.bf16.msrb.mxu1 %v1923_v15 }
 0x397   :  { %1120 = vmatpush.bf16.msra.mxu2 %v1898_v59  ;;  %1133 = vmatpush.bf16.msra.mxu3 %v1900_v62 }
 0x39a   :  { %1095 = vmatpush.bf16.msra.mxu0 %v1903_v3  ;;  %1108 = vmatpush.bf16.msrb.mxu1 %v1928_v20 }
 0x39b   :  { %1121 = vmatpush.bf16.msra.mxu2 %v1908_v5  ;;  %1134 = vmatpush.bf16.msra.mxu3 %v1910_v7 }
 0x3f9   :  { %v933_v36 = vpop.f32.mrf.mxu0  ;;  %v946_v41 = vpop.f32.mrf.mxu1 }
 0x3fa   :  { %v976_v48 = vadd.f32 %v933_v36, %v2299_v42  ;;  %v977_v54 = vadd.f32 %v946_v41, %v2300_v49 }
 0x3fc   :  { %v980_v55 = vmul.f32 0.5, %v976_v48  ;;  %v984_v60 = vmul.f32 0.5, %v977_v54 }
 0x3fe   :  { %1592 = vtanh.f32 %v980_v55  ;;  %v1530_v55 = vld [vmem:[#allocation5 + $0x38] sm:$0xff] }
 0x3ff   :  { %1594 = vtanh.f32 %v984_v60  ;;  %v1529_v60 = vld [vmem:[#allocation5 + $0x30] sm:$0xff] }
 0x400   :  { %v959_v61 = vpop.f32.mrf.mxu2  ;;  %v972_v4 = vpop.f32.mrf.mxu3 }
 0x401   :  { %v978_v8 = vadd.f32 %v959_v61, %v2301_v6  ;;  %v979_v12 = vadd.f32 %v972_v4, %v2302_v11  ;;  %v935_v14 = vpop.f32.mrf.mxu0  ;;  %v948_v19 = vpop.f32.mrf.mxu1  ;;  %v1528_v61 = vld [vmem:[#allocation5 + $0x28] sm:$0xff]  ;;  %v1527_v4 = vld [vmem:[#allocation5 + $0x20] sm:$0xff]  ;;  %v1526_v6 = vld [vmem:[#allocation5 + $0x18] sm:$0xff] }
 0x402   :  { %v1524_v11 = vld [vmem:[#allocation5 + $0x8] sm:$0xff] }
 0x403   :  { %v988_v22 = vmul.f32 0.5, %v978_v8  ;;  %1596 = vtanh.f32 %v979_v12  ;;  %v1525_v8 = vld [vmem:[#allocation5 + $0x10] sm:$0xff]  ;;  %v1523_v12 = vld [vmem:[#allocation5] sm:$0xff] }
 0x404   :  { %v1593_v28 = vpop.eup %1592 }
 0x405   :  { %v1595_v34 = vpop.eup %1594  ;;  %v982_v37 = vmul.f32 0.5, %v1593_v28  ;;  %1598 = vtanh.f32 %v988_v22  ;;  %v2307_v22 = vld [vmem:[#allocation11_spill] sm:$0xff] }
 0x406   :  { %v986_v26 = vmul.f32 0.5, %v1595_v34  ;;  %v2308_v34 = vld [vmem:[#allocation28_spill] sm:$0xff] }
 0x407   :  { %v983_v43 = vadd.f32 0.5, %v982_v37 }
 0x408   :  { %v987_v44 = vadd.f32 0.5, %v986_v26  ;;  %v961_v53 = vpop.f32.mrf.mxu2  ;;  %v974_v56 = vpop.f32.mrf.mxu3 }
 0x409   :  { %v1597_v59 = vpop.eup %1596  ;;  %v993_v62 = vmul.f32 %v983_v43, %v2216_v1  ;;  %v2309_v56 = vld [vmem:[#allocation25_spill] sm:$0xff] }
 0x40a   :  { %v994_v3 = vmul.f32 %v1597_v59, %v987_v44 }
 0x40b   :  { %v1599_v5 = vpop.eup %1598 }
 0x40c   :  { %v995_v7 = vadd.f32 %v994_v3, %v993_v62  ;;  %v990_v15 = vmul.f32 0.5, %v1599_v5  ;;  %v2310_v62 = vld [vmem:[#allocation26_spill] sm:$0xff] }
 0x40e   :  { %1600 = vtanh.f32 %v995_v7  ;;  %v991_v20 = vadd.f32 0.5, %v990_v15 }
 0x414   :  { %v1601_v63 = vpop.eup %1600 }
 0x415   :  { %v997_v16 = vmul.f32 %v1601_v63, %v991_v20 }
 0x417   :  { %v1005_v27 = vpack.c.bf16 %v997_v16, %v997_v16 }
 0x419   :  { %1014 = vmatmul.bf16.vlgmr.msrb.gmra.mxu0 %v1005_v27  ;;  %1027 = vmatmul.bf16.vlgmr.msra.gmra.mxu1 %v1005_v27 }
 0x41a   :  { %1040 = vmatmul.bf16.vlgmr.msrb.gmra.mxu2 %v1005_v27  ;;  %1053 = vmatmul.bf16.vlgmr.msrb.gmra.mxu3 %v1005_v27 }
 0x41b   :  { %1228 = vmatpush.bf16.msrb.mxu0 %v1530_v55 }
 0x41f   :  { %1229 = vmatpush.bf16.msrb.mxu0 %v1529_v60 }
 0x423   :  { %1230 = vmatpush.bf16.msrb.mxu0 %v1528_v61 }
 0x427   :  { %1231 = vmatpush.bf16.msrb.mxu0 %v1527_v4 }
 0x42b   :  { %1232 = vmatpush.bf16.msrb.mxu0 %v1526_v6 }
 0x42f   :  { %1233 = vmatpush.bf16.msrb.mxu0 %v1525_v8 }
 0x433   :  { %1234 = vmatpush.bf16.msrb.mxu0 %v1524_v11 }
 0x437   :  { %1235 = vmatpush.bf16.msrb.mxu0 %v1523_v12 }
 0x496   :  { %v1015_v2 = vpop.f32.mrf.mxu0  ;;  %v1028_v21 = vpop.f32.mrf.mxu1 }
 0x497   :  { %v1058_v51 = vadd.f32 %v1015_v2, %v2303_v52  ;;  %v1059_v40 = vadd.f32 %v1028_v21, %v2304_v25 }
 0x499   :  { %v1062_v9 = vmul.f32 0.5, %v1058_v51  ;;  %v1066_v23 = vmul.f32 0.5, %v1059_v40 }
 0x49b   :  { %1602 = vtanh.f32 %v1062_v9 }
 0x49c   :  { %1604 = vtanh.f32 %v1066_v23 }
 0x49d   :  { %v1041_v32 = vpop.f32.mrf.mxu2  ;;  %v1054_v50 = vpop.f32.mrf.mxu3 }
 0x49e   :  { %v1060_v39 = vadd.f32 %v1041_v32, %v2305_v24  ;;  %v1061_v47 = vadd.f32 %v1054_v50, %v2306_v33  ;;  %v1017_v57 = vpop.f32.mrf.mxu0  ;;  %v1030_v30 = vpop.f32.mrf.mxu1 }
 0x49f   :  { %v1179_v57 = vld [vmem:[#allocation7] sm:$0xff] }
 0x4a0   :  { %v1070_v31 = vmul.f32 0.5, %v1060_v39  ;;  %1606 = vtanh.f32 %v1061_v47 }
 0x4a1   :  { %v1603_v35 = vpop.eup %1602 }
 0x4a2   :  { %v1605_v38 = vpop.eup %1604  ;;  %v1064_v46 = vmul.f32 0.5, %v1603_v35  ;;  %1608 = vtanh.f32 %v1070_v31 }
 0x4a3   :  { %v1068_v0 = vmul.f32 0.5, %v1605_v38 }
 0x4a4   :  { %v1065_v58 = vadd.f32 0.5, %v1064_v46 }
 0x4a5   :  { %v1069_v29 = vadd.f32 0.5, %v1068_v0  ;;  %v1043_v1 = vpop.f32.mrf.mxu2  ;;  %v1056_v10 = vpop.f32.mrf.mxu3 }
 0x4a6   :  { %v1607_v45 = vpop.eup %1606  ;;  %v1075_v13 = vmul.f32 %v1065_v58, %v995_v7 }
 0x4a7   :  { %v1076_v17 = vmul.f32 %v1607_v45, %v1069_v29 }
 0x4a8   :  { %v1609_v18 = vpop.eup %1608 }
 0x4a9   :  { %v1077_v36 = vadd.f32 %v1076_v17, %v1075_v13  ;;  %v1072_v41 = vmul.f32 0.5, %v1609_v18 }
 0x4ab   :  { %1610 = vtanh.f32 %v1077_v36  ;;  %v1073_v42 = vadd.f32 0.5, %v1072_v41 }
 0x4b1   :  { %v1611_v48 = vpop.eup %1610 }
 0x4b2   :  { %v1079_v49 = vmul.f32 %v1611_v48, %v1073_v42 }
 0x4b4   :  { %v1087_v54 = vpack.c.bf16 %v1079_v49, %v1079_v49 }
 0x4b6   :  { %1096 = vmatmul.bf16.vlgmr.msra.gmra.mxu0 %v1087_v54  ;;  %1109 = vmatmul.bf16.vlgmr.msrb.gmra.mxu1 %v1087_v54 }
 0x4b7   :  { %1122 = vmatmul.bf16.vlgmr.msra.gmra.mxu2 %v1087_v54  ;;  %1135 = vmatmul.bf16.vlgmr.msra.gmra.mxu3 %v1087_v54 }
 0x533   :  { %v1097_v14 = vpop.f32.mrf.mxu0  ;;  %v1110_v19 = vpop.f32.mrf.mxu1 }
 0x534   :  { %v1140_v28 = vadd.f32 %v1097_v14, %v2307_v22  ;;  %v1141_v37 = vadd.f32 %v1110_v19, %v2308_v34 }
 0x536   :  { %v1144_v26 = vmul.f32 0.5, %v1140_v28  ;;  %v1148_v43 = vmul.f32 0.5, %v1141_v37 }
 0x538   :  { %1612 = vtanh.f32 %v1144_v26 }
 0x539   :  { %1614 = vtanh.f32 %v1148_v43 }
 0x53a   :  { %v1123_v44 = vpop.f32.mrf.mxu2  ;;  %v1136_v53 = vpop.f32.mrf.mxu3 }
 0x53b   :  { %v1142_v59 = vadd.f32 %v1123_v44, %v2309_v56  ;;  %v1143_v3 = vadd.f32 %v1136_v53, %v2310_v62  ;;  %v1099_v5 = vpop.f32.mrf.mxu0  ;;  %v1112_v7 = vpop.f32.mrf.mxu1 }
 0x53d   :  { %v1152_v15 = vmul.f32 0.5, %v1142_v59  ;;  %1616 = vtanh.f32 %v1143_v3 }
 0x53e   :  { %v1613_v20 = vpop.eup %1612 }
 0x53f   :  { %v1615_v63 = vpop.eup %1614  ;;  %v1146_v16 = vmul.f32 0.5, %v1613_v20  ;;  %1618 = vtanh.f32 %v1152_v15 }
 0x540   :  { %v1150_v27 = vmul.f32 0.5, %v1615_v63 }
 0x541   :  { %v1147_v2 = vadd.f32 0.5, %v1146_v16 }
 0x542   :  { %v1151_v21 = vadd.f32 0.5, %v1150_v27  ;;  %v1125_v52 = vpop.f32.mrf.mxu2  ;;  %v1138_v51 = vpop.f32.mrf.mxu3 }
 0x543   :  { %v1617_v25 = vpop.eup %1616  ;;  %v1157_v40 = vmul.f32 %v1147_v2, %v1077_v36 }
 0x544   :  { %v1158_v9 = vmul.f32 %v1617_v25, %v1151_v21 }
 0x545   :  { %v1619_v23 = vpop.eup %1618 }
 0x546   :  { %v1159_v32 = vadd.f32 %v1158_v9, %v1157_v40  ;;  %v1154_v50 = vmul.f32 0.5, %v1619_v23 }
 0x548   :  { %1620 = vtanh.f32 %v1159_v32  ;;  %v1155_v24 = vadd.f32 0.5, %v1154_v50 }
 0x54e   :  { %v1621_v39 = vpop.eup %1620 }
 0x54f   :  { %v1161_v33 = vmul.f32 %v1621_v39, %v1155_v24 }
 0x551   :  { %v1162_v47 = vpack.c.bf16 %v1161_v33, %v1161_v33 }
 0x553   :  { %1236 = vmatmul.bf16.vlgmr.msrb.gmra.mxu0 %v1162_v47 }
 0x5d0   :  { %v1237_v30 = vpop.f32.mrf.mxu0 }
 0x5d1   :  { %v1238_v31 = vadd.f32 %v1237_v30, %v1179_v57 }
 0x5d3   :  { %1241 = vst [vmem:[%s2272_s5] sm:$0xff] %v1238_v31 }
 0x5d8   :  { %v1239_v35 = vpop.f32.mrf.mxu0 }
 0x5d9   :  { %1246 = vsyncpa [#allocation4], 1 }
 0x5da   :  { %1247 = vsyncpa [#allocation6], 1 }

</bundles_post_ra>
